<compile_context>
chip_gen: v7x
topology: tpu7x:2x2x1
jax: 0.10.0
libtpu: 0.0.40
codegen_flags: <defaults>
</compile_context>

<pallas_src>
import functools

import jax
import jax.numpy as jnp
import numpy as np
from jax.experimental import pallas as pl
from jax.experimental.pallas import tpu as pltpu


def _convlstm_kernel(slab_ref, w_ref, c_ref, out_ref, *, hidden_dim):
    """One (batch, spatial-tile) grid step.

    slab_ref : (1, T, K)        im2col rows (+ bias ones-column), matmul dtype
    w_ref    : (K, 4*hidden)    flattened conv weight (+ bias row), matmul dtype
    c_ref    : (1, T, hidden)   c_cur
    out_ref  : (1, T, 2*hidden) [h_next | c_next]
    """
    # Single MXU pass: conv-as-matmul with the bias folded in, f32 accumulation.
    cc = jnp.dot(slab_ref[0], w_ref[...],
                 preferred_element_type=jnp.float32)          # (T, 4*hidden)

    # Lane-dense transcendentals on the full 4*hidden-wide tile, then slice.
    sig = jax.nn.sigmoid(cc)
    th = jnp.tanh(cc)
    hd = hidden_dim
    i = sig[:, 0 * hd:1 * hd]
    f = sig[:, 1 * hd:2 * hd]
    o = sig[:, 2 * hd:3 * hd]
    g = th[:, 3 * hd:4 * hd]

    c_cur = c_ref[0].astype(jnp.float32)
    c_next = f * c_cur + i * g
    h_next = o * jnp.tanh(c_next)

    out_ref[0] = jnp.concatenate([h_next, c_next],
                                 axis=-1).astype(out_ref.dtype)


def _pick_spatial_tile(hw, batch, max_tile=2048):
    """Largest sublane-aligned divisor of H*W, capped so f32 intermediates stay
    comfortably inside VMEM (v7x) and so batch==1 still yields >=2 grid cells
    (two TensorCores on v7x)."""
    cap = min(max_tile, hw)
    if batch < 2:
        cap = min(cap, max(8, hw // 2))
    for t in range(cap, 0, -1):
        if hw % t == 0 and (t % 8 == 0 or t == hw):
            return t
    return hw


def convlstm_cell_nhwc(x, h_cur, c_cur, weight_oihw, bias, kernel_size,
                       *, matmul_dtype=jnp.bfloat16, tile_hw=None):
    """ConvLSTMCell forward, NHWC in / NHWC out.

    x: (B, H, W, input_dim); h_cur, c_cur: (B, H, W, hidden_dim)
    weight_oihw: (4*hidden, input_dim+hidden, KH, KW); bias: (4*hidden,)
    Returns (h_next, c_next) in NHWC.
    """
    KH, KW = kernel_size
    # PyTorch padding=kernel_size//2 only preserves the spatial shape (which the
    # LSTM state update requires) for odd kernels; enforce it explicitly.
    assert KH % 2 == 1 and KW % 2 == 1, "kernel_size must be odd"
    B, H, W, _ = x.shape
    hidden_dim = h_cur.shape[-1]
    HW = H * W

    combined = jnp.concatenate([x, h_cur], axis=-1)            # (B, H, W, Cin)
    Cin = combined.shape[-1]
    ph, pw = KH // 2, KW // 2
    xp = jnp.pad(combined, ((0, 0), (ph, ph), (pw, pw), (0, 0)))

    # im2col slab; K ordering = (dy, dx, cin), matching the weight flattening.
    patches = [xp[:, dy:dy + H, dx:dx + W, :]
               for dy in range(KH) for dx in range(KW)]
    slab = jnp.concatenate(patches, axis=-1).reshape(B, HW, KH * KW * Cin)
    # Fold the conv bias into the matmul via a trailing ones-column / bias row.
    slab = jnp.concatenate(
        [slab, jnp.ones((B, HW, 1), dtype=slab.dtype)], axis=-1)
    slab = slab.astype(matmul_dtype)                           # (B, HW, K)
    K = slab.shape[-1]

    Cout = weight_oihw.shape[0]                                # 4 * hidden
    w = jnp.transpose(weight_oihw, (2, 3, 1, 0)).reshape(KH * KW * Cin, Cout)
    w = jnp.concatenate([w, bias.reshape(1, Cout)], axis=0)    # (K, Cout)
    w = w.astype(matmul_dtype)

    c_flat = c_cur.reshape(B, HW, hidden_dim)

    T = tile_hw if tile_hw is not None else _pick_spatial_tile(HW, B)
    assert HW % T == 0
    grid = (B, HW // T)

    kern = functools.partial(_convlstm_kernel, hidden_dim=hidden_dim)

    out_bytes = B * HW * 2 * hidden_dim * x.dtype.itemsize
    cost = pl.CostEstimate(
        flops=2 * B * HW * K * Cout,
        transcendentals=9 * B * HW * hidden_dim,
        bytes_accessed=int(slab.size * slab.dtype.itemsize
                           + w.size * w.dtype.itemsize
                           + c_flat.size * c_flat.dtype.itemsize
                           + out_bytes),
    )

    out = pl.pallas_call(
        kern,
        out_shape=jax.ShapeDtypeStruct((B, HW, 2 * hidden_dim), x.dtype),
        grid_spec=pltpu.PrefetchScalarGridSpec(
            num_scalar_prefetch=0,
            grid=grid,
            in_specs=[
                pl.BlockSpec((1, T, K), lambda b, s: (b, s, 0)),
                pl.BlockSpec((K, Cout), lambda b, s: (0, 0)),
                pl.BlockSpec((1, T, hidden_dim), lambda b, s: (b, s, 0)),
            ],
            out_specs=pl.BlockSpec((1, T, 2 * hidden_dim),
                                   lambda b, s: (b, s, 0)),
        ),
        compiler_params=pltpu.CompilerParams(
            dimension_semantics=("parallel", "parallel")),
        cost_estimate=cost,
    )(slab, w, c_flat)

    h_next = out[..., :hidden_dim].reshape(B, H, W, hidden_dim)
    c_next = out[..., hidden_dim:].reshape(B, H, W, hidden_dim)
    return h_next, c_next


def convlstm_cell(x_nchw, h_nchw, c_nchw, weight_oihw, bias, kernel_size,
                  **kwargs):
    """PyTorch-convention (NCHW) entry point. Returns (h_next, c_next) in NCHW.

    # TODO(synk): when this cell is driven in a time-step loop, keep the state
    # in NHWC across steps (call convlstm_cell_nhwc directly) and alias the
    # c/h buffers via input_output_aliases instead of transposing every step.
    """
    x = jnp.transpose(x_nchw, (0, 2, 3, 1))
    h = jnp.transpose(h_nchw, (0, 2, 3, 1))
    c = jnp.transpose(c_nchw, (0, 2, 3, 1))
    h_next, c_next = convlstm_cell_nhwc(x, h, c, weight_oihw, bias,
                                        kernel_size, **kwargs)
    return (jnp.transpose(h_next, (0, 3, 1, 2)),
            jnp.transpose(c_next, (0, 3, 1, 2)))


def convlstm_cell_reference(x, h, c, weight_oihw, bias, kernel_size):
    """Pure-JAX f32 reference mirroring the PyTorch module (NCHW)."""
    KH, KW = kernel_size
    hidden_dim = h.shape[1]
    combined = jnp.concatenate([x, h], axis=1)
    out = jax.lax.conv_general_dilated(
        combined, weight_oihw, window_strides=(1, 1),
        padding=[(KH // 2, KH // 2), (KW // 2, KW // 2)],
        dimension_numbers=("NCHW", "OIHW", "NCHW"))
    out = out + bias[None, :, None, None]
    cc_i, cc_f, cc_o, cc_g = jnp.split(out, 4, axis=1)
    i = jax.nn.sigmoid(cc_i)
    f = jax.nn.sigmoid(cc_f)
    o = jax.nn.sigmoid(cc_o)
    g = jnp.tanh(cc_g)
    c_next = f * c + i * g
    h_next = o * jnp.tanh(c_next)
    del hidden_dim
    return h_next, c_next


if __name__ == "__main__":
    # Small, deterministic config consistent with the module.
    B, input_dim, hidden_dim, H, W = 2, 4, 32, 16, 16
    kernel_size = (3, 3)
    KH, KW = kernel_size
    Cin = input_dim + hidden_dim
    Cout = 4 * hidden_dim

    key = jax.random.PRNGKey(0)
    k_x, k_h, k_c, k_w = jax.random.split(key, 4)

    x = jax.random.normal(k_x, (B, input_dim, H, W), dtype=jnp.float32)
    h_cur = jax.random.normal(k_h, (B, hidden_dim, H, W), dtype=jnp.float32)
    c_cur = jax.random.normal(k_c, (B, hidden_dim, H, W), dtype=jnp.float32)

    # Xavier-uniform init of conv weight (OIHW), zero bias (matches __init__).
    fan_in = Cin * KH * KW
    fan_out = Cout * KH * KW
    bound = float(np.sqrt(6.0 / (fan_in + fan_out)))
    weight = jax.random.uniform(k_w, (Cout, Cin, KH, KW), dtype=jnp.float32,
                                minval=-bound, maxval=bound)
    bias = jnp.zeros((Cout,), dtype=jnp.float32)

    # Main path: bf16 MXU inputs, f32 accumulation + f32 gate math.
    h_next, c_next = convlstm_cell(x, h_cur, c_cur, weight, bias, kernel_size)
    jax.block_until_ready((h_next, c_next))

    h_ref, c_ref = convlstm_cell_reference(x, h_cur, c_cur, weight, bias,
                                           kernel_size)
    np.testing.assert_allclose(np.asarray(h_next), np.asarray(h_ref),
                               rtol=5e-2, atol=5e-2)
    np.testing.assert_allclose(np.asarray(c_next), np.asarray(c_ref),
                               rtol=5e-2, atol=5e-2)

    # Extra validation of the kernel math with full-precision matmul inputs.
    h32, c32 = convlstm_cell(x, h_cur, c_cur, weight, bias, kernel_size,
                             matmul_dtype=jnp.float32)
    jax.block_until_ready((h32, c32))
    np.testing.assert_allclose(np.asarray(h32), np.asarray(h_ref),
                               rtol=1e-4, atol=1e-4)
    np.testing.assert_allclose(np.asarray(c32), np.asarray(c_ref),
                               rtol=1e-4, atol=1e-4)

    print("KERNEL_OK")
</pallas_src>

<mosaic_0001>
module attributes {stable_mosaic.version = 11 : i64} {
  func.func @_convlstm_kernel(%arg0: i32, %arg1: i32, %arg2: memref<1x256x325xbf16, #tpu.memory_space<vmem>>, %arg3: memref<325x128xbf16, #tpu.memory_space<vmem>>, %arg4: memref<1x256x32xf32, #tpu.memory_space<vmem>>, %arg5: memref<1x256x64xf32, #tpu.memory_space<vmem>>) attributes {dimension_semantics = [#tpu.dimension_semantics<parallel>, #tpu.dimension_semantics<parallel>], iteration_bounds = array<i64: 2, 1>, scalar_prefetch = 0 : i64, scratch_operands = 0 : i64, tpu.core_type = #tpu.core_type<tc>, window_params = [{transform_indices = @transform_0, window_bounds = array<i64: 1, 256, 325>}, {pipeline_mode = #tpu.pipeline_mode<synchronous>, transform_indices = @transform_1, window_bounds = array<i64: 325, 128>}, {transform_indices = @transform_2, window_bounds = array<i64: 1, 256, 32>}, {transform_indices = @transform_3, window_bounds = array<i64: 1, 256, 64>}]} {
    %c0 = arith.constant 0 : index
    %c0_0 = arith.constant 0 : index
    %c0_1 = arith.constant 0 : index
    %0 = vector.load %arg2[%c0, %c0_0, %c0_1] : memref<1x256x325xbf16, #tpu.memory_space<vmem>>, vector<1x256x325xbf16>
    %1 = vector.shape_cast %0 : vector<1x256x325xbf16> to vector<256x325xbf16>
    %c0_2 = arith.constant 0 : index
    %c0_3 = arith.constant 0 : index
    %2 = vector.load %arg3[%c0_2, %c0_3] : memref<325x128xbf16, #tpu.memory_space<vmem>>, vector<325x128xbf16>
    %cst = arith.constant dense<0.000000e+00> : vector<256x128xf32>
    %3 = tpu.matmul %1, %2, %cst {dimension_numbers = #tpu.dot_dimension_numbers<[1], [0], [0], [1], [0, 0, 1, 1], [], []>} : vector<256x325xbf16>, vector<325x128xbf16>, vector<256x128xf32> -> vector<256x128xf32>
    %4 = arith.negf %3 : vector<256x128xf32>
    %5 = math.exp %4 : vector<256x128xf32>
    %cst_4 = arith.constant 1.000000e+00 : f32
    %6 = vector.broadcast %cst_4 : f32 to vector<256x128xf32>
    %7 = arith.addf %6, %5 : vector<256x128xf32>
    %8 = arith.divf %6, %7 : vector<256x128xf32>
    %9 = math.tanh %3 : vector<256x128xf32>
    %10 = vector.extract_strided_slice %8 {offsets = [0, 0], sizes = [256, 32], strides = [1, 1]} : vector<256x128xf32> to vector<256x32xf32>
    %11 = vector.extract_strided_slice %8 {offsets = [0, 32], sizes = [256, 32], strides = [1, 1]} : vector<256x128xf32> to vector<256x32xf32>
    %12 = vector.extract_strided_slice %8 {offsets = [0, 64], sizes = [256, 32], strides = [1, 1]} : vector<256x128xf32> to vector<256x32xf32>
    %13 = vector.extract_strided_slice %9 {offsets = [0, 96], sizes = [256, 32], strides = [1, 1]} : vector<256x128xf32> to vector<256x32xf32>
    %c0_5 = arith.constant 0 : index
    %c0_6 = arith.constant 0 : index
    %c0_7 = arith.constant 0 : index
    %14 = vector.load %arg4[%c0_5, %c0_6, %c0_7] : memref<1x256x32xf32, #tpu.memory_space<vmem>>, vector<1x256x32xf32>
    %15 = vector.shape_cast %14 : vector<1x256x32xf32> to vector<256x32xf32>
    %16 = arith.mulf %11, %15 : vector<256x32xf32>
    %17 = arith.mulf %10, %13 : vector<256x32xf32>
    %18 = arith.addf %16, %17 : vector<256x32xf32>
    %19 = math.tanh %18 : vector<256x32xf32>
    %20 = arith.mulf %12, %19 : vector<256x32xf32>
    %21 = tpu.concatenate %20, %18 in 1 : vector<256x32xf32>, vector<256x32xf32> -> vector<256x64xf32>
    %c0_8 = arith.constant 0 : index
    %c0_9 = arith.constant 0 : index
    %c0_10 = arith.constant 0 : index
    %22 = vector.load %arg5[%c0_8, %c0_9, %c0_10] : memref<1x256x64xf32, #tpu.memory_space<vmem>>, vector<1x256x64xf32>
    %23 = vector.shape_cast %22 : vector<1x256x64xf32> to vector<256x64xf32>
    %24 = vector.shape_cast %21 : vector<256x64xf32> to vector<1x256x64xf32>
    tpu.vector_store %arg5[%c0_8, %c0_9, %c0_10], %24 {strides = array<i32>} : memref<1x256x64xf32, #tpu.memory_space<vmem>>, vector<1x256x64xf32>,
    return
  }
  func.func @transform_0(%arg0: i32, %arg1: i32) -> (i32, i32, i32) {
    %c0_i32 = arith.constant 0 : i32
    %c0_i32_0 = arith.constant 0 : i32
    return %arg0, %arg1, %c0_i32 : i32, i32, i32
  }
  func.func @transform_1(%arg0: i32, %arg1: i32) -> (i32, i32) {
    %c0_i32 = arith.constant 0 : i32
    %c0_i32_0 = arith.constant 0 : i32
    %c0_i32_1 = arith.constant 0 : i32
    return %c0_i32, %c0_i32_0 : i32, i32
  }
  func.func @transform_2(%arg0: i32, %arg1: i32) -> (i32, i32, i32) {
    %c0_i32 = arith.constant 0 : i32
    %c0_i32_0 = arith.constant 0 : i32
    return %arg0, %arg1, %c0_i32 : i32, i32, i32
  }
  func.func @transform_3(%arg0: i32, %arg1: i32) -> (i32, i32, i32) {
    %c0_i32 = arith.constant 0 : i32
    %c0_i32_0 = arith.constant 0 : i32
    return %arg0, %arg1, %c0_i32 : i32, i32, i32
  }
}

</mosaic_0001>

<bundles_post_ra>
// kernel: tpu_custom_call.1
= control target key start
LH: loop header
LB: loop body
LE: loop exit
PB: predicated region body
PF: predicated region fallthrough
CT: control target
= control target key end

     0   :  { %s3064_s12 = smov 0   ;;  %s3066_s13 = smov 0   ;;  %s4071_s0 = inlined_call_operand.vmem [shape: bf16[2,256,325], index: 0, kind: input, shape index: {}]   ;;  %s4072_s1 = inlined_call_operand.vmem [shape: bf16[325,128], index: 1, kind: input, shape index: {}]   ;;  %s4073_s2 = inlined_call_operand.vmem [shape: f32[2,256,32], index: 2, kind: input, shape index: {}]   ;;  %s4074_s3 = inlined_call_operand.vmem [shape: f32[2,256,64], index: 3, kind: output, shape index: {}]  }
   0x1   :  { %s3068_s14 = smov 0  }
   0x2 LB: > { %s25_s15 = sadd.s32 1, %s3035_s13  ;;  %p2330_p0 = scmp.ge.s32.totalorder %s3039_s14, 1  ;;  %s3039_s14 = sphi %s3068_s14, %s13_s14   ;;  %s3035_s13 = sphi %s3066_s13, %s4130_s13   ;;  %s3031_s12 = sphi %s3064_s12, %s4129_s12  }
   0x3   : > { %p27_p1 = scmp.ge.s32.totalorder %s25_s15, 2  ;;  %p176_p2 = scmp.lt.s32.totalorder %s3039_s14, 3 }
   0x5   : > { %s4132_s15 = smov (%p27_p1, %s25_s15), 0  ;;  %p177_p3 = pnand %p2330_p0, %p176_p2 }
   0x7   : > { %180 = sbr.rel (%p177_p3) target bundleno = 880 (0x370), region = 32 }
   0xe   : > { %v2676_v0 = vld [vmem:[%s4072_s1 + $0x40] sm:$0xff]   ;;  %v2678_v2 = vld [vmem:[%s4072_s1 + $0x48] sm:$0xff]   ;;  %p219_p4 = scmp.lt.s32.totalorder %s3031_s12, 1  ;;  %v2680_v4 = vld [vmem:[%s4072_s1 + $0x50] sm:$0xff]   ;;  %vm767_vm0 = vcmask 1041408   ;;  %vm768_vm1 = vcmask 1042432  }
   0xf   : > { %v2677_v1 = vld [vmem:[%s4072_s1] sm:$0xff]   ;;  %2457 = vmatprep.subr.bf16.mxu0 %v2676_v0  ;;  %2632 = vmatprep.subr.bf16.mxu1 %v2676_v0  ;;  %v2679_v3 = vld [vmem:[%s4072_s1 + $0x8] sm:$0xff]   ;;  %v2681_v5 = vld [vmem:[%s4072_s1 + $0x10] sm:$0xff]   ;;  %v3041_v29 = vmov 65535   ;;  %vm718_vm2 = vcmask 564224   ;;  %s3042_s21 = smov 32  }
  0x10   : > { %2458 = vmatpush3.bf16.msra.mxu0 %v2677_v1  ;;  %2640 = vmatpush3.bf16.msra.mxu1 %v2677_v1  ;;  %s4134_s12 = smov (!%p219_p4, %s3031_s12), 1  ;;  %v2682_v6 = vld [vmem:[%s4072_s1 + $0x58] sm:$0xff]   ;;  %v2684_v8 = vld [vmem:[%s4072_s1 + $0x60] sm:$0xff]   ;;  %v2686_v10 = vld [vmem:[%s4072_s1 + $0x68] sm:$0xff]   ;;  %v769_v30 = vsel %vm767_vm0, 4294967295, %v3041_v29  ;;  %vm2152_vm3 = vcmask 261120  }
  0x11   : > { %2459 = vmatprep.subr.bf16.mxu0 %v2678_v2  ;;  %2633 = vmatprep.subr.bf16.mxu1 %v2678_v2  ;;  %s2648_s30 = smul.u32 384, %s4134_s12  ;;  %v2683_v7 = vld [vmem:[%s4072_s1 + $0x18] sm:$0xff]   ;;  %v2685_v9 = vld [vmem:[%s4072_s1 + $0x20] sm:$0xff]   ;;  %v2687_v13 = vld [vmem:[%s4072_s1 + $0x28] sm:$0xff]   ;;  %v770_v33 = vsel %vm768_vm1, %v769_v30, 0  ;;  %s2455_s17 = sshll.u32 %s4134_s12, 8 }
  0x12   : > { %v2688_v14 = vld [vmem:[%s4072_s1 + $0x70] sm:$0xff]   ;;  %v2690_v16 = vld [vmem:[%s4072_s1 + $0x78] sm:$0xff]   ;;  %v2698_v18 = vld [vmem:[%s4072_s1 + $0x80] sm:$0xff]   ;;  %s3177_s20 = scalar_lea.vmem %s4073_s2, %s2455_s17  ;;  %s3932_s24 = scalar_lea.vmem %s4074_s3, %s2455_s17  ;;  %vm2185_vm4 = vcmask 523264  }
  0x13   : > { %s3115_s10 = scalar_lea.vmem %s4071_s0, %s2648_s30  ;;  %v2689_v15 = vld [vmem:[%s4072_s1 + $0x30] sm:$0xff]   ;;  %v2691_v17 = vld [vmem:[%s4072_s1 + $0x38] sm:$0xff]   ;;  %v2703_v23 = vld [vmem:[%s4072_s1 + $0x88] sm:$0xff]  }
  0x14   : > { %2460 = vmatpush3.bf16.msra.mxu0 %v2679_v3  ;;  %2641 = vmatpush3.bf16.msra.mxu1 %v2679_v3  ;;  %v2694_v11 = vld [vmem:[%s3115_s10 + $0x4] ss:$12 sps:$4 sm:$0xff]   ;;  %v2692_v19 = vld [vmem:[%s3115_s10] ss:$12 sps:$4 sm:$0xff]   ;;  %v2699_v21 = vld [vmem:[%s3115_s10 + $0x1c] ss:$12 sps:$4 sm:$0xff]  }
  0x15   : > { %2461 = vmatprep.subr.bf16.mxu0 %v2680_v4  ;;  %2634 = vmatprep.subr.bf16.mxu1 %v2680_v4  ;;  %v2697_v12 = vld [vmem:[%s3115_s10 + $0x124] ss:$12 sps:$4 sm:$0xff]   ;;  %v2695_v20 = vld [vmem:[%s3115_s10 + $0x120] ss:$12 sps:$4 sm:$0xff]   ;;  %v2701_v22 = vld [vmem:[%s3115_s10 + $0x13c] ss:$12 sps:$4 sm:$0xff]  }
  0x16   : > { %806 = vmatprep.mubr.bf16.mxu0 %v2694_v11  ;;  %902 = vmatprep.mubr.bf16.mxu1 %v2697_v12  ;;  %v2704_v24 = vld [vmem:[%s3115_s10 + $0x18] ss:$12 sps:$4 sm:$0xff]   ;;  %v2706_v26 = vld [vmem:[%s4072_s1 + $0x90] sm:$0xff]   ;;  %v2720_v28 = vld [vmem:[%s4072_s1 + $0xa0] ss:$0 sps:$4 sm:$0x77]  }
  0x17   : > { %v2705_v25 = vld [vmem:[%s3115_s10 + $0x138] ss:$12 sps:$4 sm:$0xff]   ;;  %v2707_v27 = vld [vmem:[%s3115_s10 + $0x34] ss:$12 sps:$4 sm:$0xff]   ;;  %v772_v34 = vand.u32 %v2720_v28, %v770_v33  ;;  %v2711_v35 = vld [vmem:[%s3115_s10 + $0x30] ss:$12 sps:$4 sm:$0xff]  }
  0x18   : > { %2462 = vmatpush3.bf16.msra.mxu0 %v2681_v5  ;;  %2642 = vmatpush3.bf16.msra.mxu1 %v2681_v5  ;;  %v2709_v31 = vld [vmem:[%s3115_s10 + $0x154] ss:$12 sps:$4 sm:$0xff]   ;;  %v2713_v32 = vld [vmem:[%s4072_s1 + $0x98] sm:$0xff]   ;;  %v2721_v41 = vld [vmem:[%s3115_s10 + $0x64] ss:$12 sps:$4 sm:$0xff]  }
  0x19   : > { %2463 = vmatprep.subr.bf16.mxu0 %v2682_v6  ;;  %2635 = vmatprep.subr.bf16.mxu1 %v2682_v6  ;;  %v2712_v36 = vld [vmem:[%s3115_s10 + $0x150] ss:$12 sps:$4 sm:$0xff]   ;;  %v2714_v37 = vld [vmem:[%s3115_s10 + $0x4c] ss:$12 sps:$4 sm:$0xff]   ;;  %v2718_v39 = vld [vmem:[%s3115_s10 + $0x48] ss:$12 sps:$4 sm:$0xff]  }
  0x1a   : > { %v2716_v38 = vld [vmem:[%s3115_s10 + $0x16c] ss:$12 sps:$4 sm:$0xff]   ;;  %v2719_v40 = vld [vmem:[%s3115_s10 + $0x168] ss:$12 sps:$4 sm:$0xff]   ;;  %v1320_v43 = vld [vmem:[%s3177_s20] sm:$0xff] }
  0x1b   : > { %v2723_v42 = vld [vmem:[%s3115_s10 + $0x8] ss:$12 sps:$4 sm:$0xff]   ;;  %1384 = vrot.lane.b32.xlu0 %v1320_v43, %s3042_s21  ;;  %v1323_v46 = vld [vmem:[%s3177_s20 + $0x18] sm:$0xff]  ;;  %v2724_v47 = vld [vmem:[%s3115_s10 + $0x60] ss:$12 sps:$4 sm:$0xff]  }
  0x1c   : > { %2464 = vmatpush3.bf16.msra.mxu0 %v2683_v7  ;;  %2643 = vmatpush3.bf16.msra.mxu1 %v2683_v7  ;;  %v1322_v44 = vld [vmem:[%s3177_s20 + $0x10] sm:$0xff]  ;;  %v1321_v45 = vld [vmem:[%s3177_s20 + $0x8] sm:$0xff]  ;;  %v2728_v50 = vld [vmem:[%s3115_s10 + $0x38] ss:$12 sps:$4 sm:$0xff]  }
  0x1d   : > { %2465 = vmatprep.subr.bf16.mxu0 %v2684_v8  ;;  %2636 = vmatprep.subr.bf16.mxu1 %v2684_v8  ;;  %v2725_v48 = vld [vmem:[%s3115_s10 + $0x20] ss:$12 sps:$4 sm:$0xff]   ;;  %v2726_v49 = vld [vmem:[%s3115_s10 + $0x7c] ss:$12 sps:$4 sm:$0xff]   ;;  %v1326_v53 = vld [vmem:[%s3177_s20 + $0x30] sm:$0xff] }
  0x1e   : > { %1388 = vrot.lane.b32.xlu1 %v1322_v44, %s3042_s21  ;;  %v1324_v51 = vld [vmem:[%s3177_s20 + $0x20] sm:$0xff]  ;;  %v1325_v52 = vld [vmem:[%s3177_s20 + $0x28] sm:$0xff]  ;;  %v1327_v54 = vld [vmem:[%s3177_s20 + $0x38] sm:$0xff] }
  0x1f   : > { %1386 = vrot.lane.b32.xlu0 %v1321_v45, %s3042_s21  ;;  %v2729_v55 = vld [vmem:[%s3115_s10 + $0x78] ss:$12 sps:$4 sm:$0xff]   ;;  %v2730_v56 = vld [vmem:[%s3115_s10 + $0x50] ss:$12 sps:$4 sm:$0xff]   ;;  %v2731_v57 = vld [vmem:[%s3115_s10 + $0x94] ss:$12 sps:$4 sm:$0xff]  }
  0x20   : > { %2466 = vmatpush3.bf16.msra.mxu0 %v2685_v9  ;;  %2644 = vmatpush3.bf16.msra.mxu1 %v2685_v9  ;;  %v2733_v58 = vld [vmem:[%s3115_s10 + $0x68] ss:$12 sps:$4 sm:$0xff]   ;;  %v1328_v59 = vld [vmem:[%s3177_s20 + $0x40] sm:$0xff]  ;;  %v1331_v62 = vld [vmem:[%s3177_s20 + $0x58] sm:$0xff] }
  0x21   : > { %2467 = vmatprep.subr.bf16.mxu0 %v2686_v10  ;;  %2637 = vmatprep.subr.bf16.mxu1 %v2686_v10  ;;  %v1329_v60 = vld [vmem:[%s3177_s20 + $0x48] sm:$0xff]  ;;  %v1330_v61 = vld [vmem:[%s3177_s20 + $0x50] sm:$0xff]  ;;  %v2738_v2 = vld [vmem:[%s3115_s10 + $0x98] ss:$12 sps:$4 sm:$0xff]  }
  0x22   : > { %1390 = vrot.lane.b32.xlu1 %v1323_v46, %s3042_s21  ;;  %v2734_v63 = vld [vmem:[%s3115_s10 + $0x90] ss:$12 sps:$4 sm:$0xff]   ;;  %v2735_v0 = vld [vmem:[%s3115_s10 + $0x80] ss:$12 sps:$4 sm:$0xff]   ;;  %v2739_v7 = vld [vmem:[%s3115_s10 + $0xa8] ss:$12 sps:$4 sm:$0xff]  }
  0x23   : > { %1392 = vrot.lane.b32.xlu0 %v1324_v51, %s3042_s21  ;;  %v2736_v1 = vld [vmem:[%s3115_s10 + $0xac] ss:$12 sps:$4 sm:$0xff]   ;;  %v1332_v3 = vld [vmem:[%s3177_s20 + $0x60] sm:$0xff]  ;;  %v1334_v5 = vld [vmem:[%s3177_s20 + $0x70] sm:$0xff] }
  0x24   : > { %2468 = vmatpush3.bf16.msra.mxu0 %v2687_v13  ;;  %2645 = vmatpush3.bf16.msra.mxu1 %v2687_v13  ;;  %v1333_v4 = vld [vmem:[%s3177_s20 + $0x68] sm:$0xff]  ;;  %v1335_v6 = vld [vmem:[%s3177_s20 + $0x78] sm:$0xff]  ;;  %v2741_v9 = vld [vmem:[%s3115_s10 + $0xc4] ss:$12 sps:$4 sm:$0xff]  }
  0x25   : > { %2469 = vmatprep.subr.bf16.mxu0 %v2688_v14  ;;  %2638 = vmatprep.subr.bf16.mxu1 %v2688_v14  ;;  %v2740_v8 = vld [vmem:[%s3115_s10 + $0xb0] ss:$12 sps:$4 sm:$0xff]   ;;  %v2743_v10 = vld [vmem:[%s3115_s10 + $0xc8] ss:$12 sps:$4 sm:$0xff]   ;;  %v1336_v11 = vld [vmem:[%s3177_s20 + $0x80] sm:$0xff] }
  0x26   : > { %1394 = vrot.lane.b32.xlu1 %v1325_v52, %s3042_s21  ;;  %v1337_v12 = vld [vmem:[%s3177_s20 + $0x88] sm:$0xff]  ;;  %v1338_v13 = vld [vmem:[%s3177_s20 + $0x90] sm:$0xff]  ;;  %v1339_v14 = vld [vmem:[%s3177_s20 + $0x98] sm:$0xff] }
  0x27   : > { %1396 = vrot.lane.b32.xlu0 %v1326_v53, %s3042_s21  ;;  %v1345_v28 = vld [vmem:[%s3177_s20 + $0xc8] sm:$0xff]  ;;  %v1346_v29 = vld [vmem:[%s3177_s20 + $0xd0] sm:$0xff]  ;;  %v1347_v30 = vld [vmem:[%s3177_s20 + $0xd8] sm:$0xff] }
  0x28   : > { %2470 = vmatpush3.bf16.msra.mxu0 %v2689_v15  ;;  %2646 = vmatpush3.bf16.msra.mxu1 %v2689_v15  ;;  %v2744_v15 = vld [vmem:[%s3115_s10 + $0xc0] ss:$12 sps:$4 sm:$0xff]  }
  0x29   : > { %2471 = vmatprep.subr.bf16.mxu0 %v2690_v16  ;;  %2639 = vmatprep.subr.bf16.mxu1 %v2690_v16  ;;  %v2745_v16 = vld [vmem:[%s3115_s10 + $0xe0] ss:$12 sps:$4 sm:$0xff]  }
  0x2a   : > { %1398 = vrot.lane.b32.xlu1 %v1327_v54, %s3042_s21  ;;  %v2756_v33 = vld [vmem:[%s3115_s10 + $0x10c] ss:$12 sps:$4 sm:$0xff]  }
  0x2b   : > { %1400 = vrot.lane.b32.xlu0 %v1328_v59, %s3042_s21 }
  0x2c   : > { %2472 = vmatpush3.bf16.msra.mxu0 %v2691_v17  ;;  %2647 = vmatpush3.bf16.msra.mxu1 %v2691_v17  ;;  %v2746_v17 = vld [vmem:[%s3115_s10 + $0xdc] ss:$12 sps:$4 sm:$0xff]  }
  0x2d   : > { %2590 = vmatprep.subr.bf16.mxu1 %v2698_v18 }
  0x2e   : > { %1402 = vrot.lane.b32.xlu1 %v1329_v60, %s3042_s21 }
  0x2f   : > { %807 = vmatmul.mubr.bf16.vlgmr.msra.gmra.mrb[0].mxu0 %v2692_v19  ;;  %903 = vmatmul.mubr.bf16.vlgmr.msra.gmra.mrb[0].mxu1 %v2695_v20  ;;  %v1340_v19 = vld [vmem:[%s3177_s20 + $0xa0] sm:$0xff]  ;;  %v1341_v20 = vld [vmem:[%s3177_s20 + $0xa8] sm:$0xff] }
  0x30   : > { %2591 = vmatpush3.bf16.msra.mxu1 %v2698_v18  ;;  %814 = vmatprep.mubr.bf16.mxu0 %v2699_v21  ;;  %v2748_v18 = vld [vmem:[%s3115_s10 + $0xf8] ss:$12 sps:$4 sm:$0xff]   ;;  %v1342_v21 = vld [vmem:[%s3177_s20 + $0xb0] sm:$0xff] }
  0x31   : > { %910 = vmatprep.mubr.bf16.mxu1 %v2701_v22  ;;  %2592 = vmatprep.subr.bf16.mxu1 %v2703_v23  ;;  %v1343_v22 = vld [vmem:[%s3177_s20 + $0xb8] sm:$0xff] }
  0x32   : > { %1404 = vrot.lane.b32.xlu0 %v1330_v61, %s3042_s21  ;;  %1406 = vrot.lane.b32.xlu1 %v1331_v62, %s3042_s21 }
  0x34   : > { %2593 = vmatpush3.bf16.msra.mxu1 %v2703_v23  ;;  %v2749_v23 = vld [vmem:[%s3115_s10 + $0xd8] ss:$12 sps:$4 sm:$0xff]  }
  0x35   : > { %2594 = vmatprep.subr.bf16.mxu1 %v2706_v26 }
  0x36   : > { %1408 = vrot.lane.b32.xlu0 %v1332_v3, %s3042_s21  ;;  %1410 = vrot.lane.b32.xlu1 %v1333_v4, %s3042_s21 }
  0x37   : > { %815 = vmatmul.mubr.bf16.gmra.mrb[4].mxu0 %v2704_v24  ;;  %911 = vmatmul.mubr.bf16.gmra.mrb[4].mxu1 %v2705_v25  ;;  %v2750_v24 = vld [vmem:[%s3115_s10 + $0x110] ss:$12 sps:$4 sm:$0xff]   ;;  %v2751_v25 = vld [vmem:[%s3115_s10 + $0xf4] ss:$12 sps:$4 sm:$0xff]  }
  0x38   : > { %2595 = vmatpush3.bf16.msra.mxu1 %v2706_v26  ;;  %822 = vmatprep.mubr.bf16.mxu0 %v2707_v27  ;;  %v2753_v26 = vld [vmem:[%s3115_s10 + $0x128] ss:$12 sps:$4 sm:$0xff]   ;;  %v1344_v27 = vld [vmem:[%s3177_s20 + $0xc0] sm:$0xff] }
  0x39   : > { %918 = vmatprep.mubr.bf16.mxu1 %v2709_v31  ;;  %2596 = vmatprep.subr.bf16.mxu1 %v2713_v32  ;;  %v2754_v31 = vld [vmem:[%s3115_s10 + $0xf0] ss:$12 sps:$4 sm:$0xff]  }
  0x3a   : > { %1412 = vrot.lane.b32.xlu0 %v1334_v5, %s3042_s21  ;;  %1414 = vrot.lane.b32.xlu1 %v1335_v6, %s3042_s21 }
  0x3c   : > { %2597 = vmatpush3.bf16.msra.mxu1 %v2713_v32  ;;  %v2755_v32 = vld [vmem:[%s3115_s10 + $0x140] ss:$12 sps:$4 sm:$0xff]  }
  0x3d   : > { %2598 = vmatprep.subr.bf16.mxu1 %v772_v34 }
  0x3e   : > { %1416 = vrot.lane.b32.xlu0 %v1336_v11, %s3042_s21  ;;  %1418 = vrot.lane.b32.xlu1 %v1337_v12, %s3042_s21 }
  0x3f   : > { %823 = vmatmul.mubr.bf16.gmra.mrb[8].mxu0 %v2711_v35  ;;  %919 = vmatmul.mubr.bf16.gmra.mrb[8].mxu1 %v2712_v36  ;;  %v1348_v35 = vld [vmem:[%s3177_s20 + $0xe0] sm:$0xff]  ;;  %v1349_v36 = vld [vmem:[%s3177_s20 + $0xe8] sm:$0xff] }
  0x40   : > { %830 = vmatprep.mubr.bf16.mxu0 %v2714_v37  ;;  %926 = vmatprep.mubr.bf16.mxu1 %v2716_v38  ;;  %v2759_v37 = vld [vmem:[%s3115_s10 + $0x108] ss:$12 sps:$4 sm:$0xff]   ;;  %v2760_v38 = vld [vmem:[%s3115_s10 + $0x170] ss:$12 sps:$4 sm:$0xff]  }
  0x41   : > { %2599 = vmatpush3.bf16.msra.mxu1 %v772_v34  ;;  %v2758_v34 = vld [vmem:[%s3115_s10 + $0x158] ss:$12 sps:$4 sm:$0xff]   ;;  %s3043_s10 = smov 64  }
  0x42   : > { %1420 = vrot.lane.b32.xlu0 %v1338_v13, %s3042_s21  ;;  %1422 = vrot.lane.b32.xlu1 %v1339_v14, %s3042_s21 }
  0x46   : > { %1424 = vrot.lane.b32.xlu0 %v1340_v19, %s3042_s21  ;;  %1426 = vrot.lane.b32.xlu1 %v1341_v20, %s3042_s21 }
  0x47   : > { %831 = vmatmul.mubr.bf16.gmra.mrb[12].mxu0 %v2718_v39  ;;  %927 = vmatmul.mubr.bf16.gmra.mrb[12].mxu1 %v2719_v40  ;;  %v1350_v39 = vld [vmem:[%s3177_s20 + $0xf0] sm:$0xff]  ;;  %v1351_v40 = vld [vmem:[%s3177_s20 + $0xf8] sm:$0xff] }
  0x48   : > { %838 = vmatprep.mubr.bf16.mxu0 %v2721_v41  ;;  %2600 = vmatprep.mubr.msk.bf16.mxu1 %vm718_vm2, %v2723_v42 }
  0x4a   : > { %1428 = vrot.lane.b32.xlu0 %v1342_v21, %s3042_s21  ;;  %1430 = vrot.lane.b32.xlu1 %v1343_v22, %s3042_s21 }
  0x4e   : > { %1432 = vrot.lane.b32.xlu0 %v1344_v27, %s3042_s21  ;;  %1434 = vrot.lane.b32.xlu1 %v1345_v28, %s3042_s21 }
  0x4f   : > { %839 = vmatmul.mubr.bf16.gmra.mrb[16].mxu0 %v2724_v47  ;;  %2601 = vmatmul.mubr.msk.bf16.vlgmr.msra.gmra.mrb[16].mxu1 %vm718_vm2, %v2725_v48 }
  0x50   : > { %846 = vmatprep.mubr.bf16.mxu0 %v2726_v49  ;;  %2604 = vmatprep.mubr.msk.bf16.mxu1 %vm718_vm2, %v2728_v50 }
  0x52   : > { %1436 = vrot.lane.b32.xlu0 %v1346_v29, %s3042_s21  ;;  %1438 = vrot.lane.b32.xlu1 %v1347_v30, %s3042_s21 }
  0x56   : > { %1440 = vrot.lane.b32.xlu0 %v1348_v35, %s3042_s21  ;;  %1442 = vrot.lane.b32.xlu1 %v1349_v36, %s3042_s21 }
  0x57   : > { %847 = vmatmul.mubr.bf16.gmra.mrb[20].mxu0 %v2729_v55  ;;  %2605 = vmatmul.mubr.msk.bf16.gmra.mrb[20].mxu1 %vm718_vm2, %v2730_v56 }
  0x58   : > { %854 = vmatprep.mubr.bf16.mxu0 %v2731_v57  ;;  %2608 = vmatprep.mubr.msk.bf16.mxu1 %vm718_vm2, %v2733_v58 }
  0x5a   : > { %1444 = vrot.lane.b32.xlu0 %v1350_v39, %s3042_s21  ;;  %1446 = vrot.lane.b32.xlu1 %v1351_v40, %s3042_s21 }
  0x5f   : > { %855 = vmatmul.mubr.bf16.gmra.mrb[24].mxu0 %v2734_v63  ;;  %2609 = vmatmul.mubr.msk.bf16.gmra.mrb[24].mxu1 %vm718_vm2, %v2735_v0 }
  0x60   : > { %862 = vmatprep.mubr.bf16.mxu0 %v2736_v1  ;;  %2612 = vmatprep.mubr.msk.bf16.mxu1 %vm718_vm2, %v2738_v2 }
  0x67   : > { %863 = vmatmul.mubr.bf16.gmra.mrb[28].mxu0 %v2739_v7  ;;  %2613 = vmatmul.mubr.msk.bf16.gmra.mrb[28].mxu1 %vm718_vm2, %v2740_v8 }
  0x68   : > { %870 = vmatprep.mubr.bf16.mxu0 %v2741_v9  ;;  %2616 = vmatprep.mubr.msk.bf16.mxu1 %vm718_vm2, %v2743_v10 }
  0x6f   : > { %871 = vmatmul.mubr.bf16.gmra.mrb[32].mxu0 %v2744_v15  ;;  %2617 = vmatmul.mubr.msk.bf16.gmra.mrb[32].mxu1 %vm718_vm2, %v2745_v16 }
  0x70   : > { %878 = vmatprep.mubr.bf16.mxu0 %v2746_v17  ;;  %2620 = vmatprep.mubr.msk.bf16.mxu1 %vm718_vm2, %v2748_v18 }
  0x77   : > { %879 = vmatmul.mubr.bf16.gmra.mrb[36].mxu0 %v2749_v23  ;;  %2621 = vmatmul.mubr.msk.bf16.gmra.mrb[36].mxu1 %vm718_vm2, %v2750_v24 }
  0x78   : > { %886 = vmatprep.mubr.bf16.mxu0 %v2751_v25  ;;  %2624 = vmatprep.mubr.msk.bf16.mxu1 %vm718_vm2, %v2753_v26 }
  0x7f   : > { %887 = vmatmul.mubr.bf16.gmra.mrb[40].mxu0 %v2754_v31  ;;  %2625 = vmatmul.mubr.msk.bf16.gmra.mrb[40].mxu1 %vm718_vm2, %v2755_v32 }
  0x80   : > { %894 = vmatprep.mubr.bf16.mxu0 %v2756_v33  ;;  %2628 = vmatprep.mubr.msk.bf16.mxu1 %vm718_vm2, %v2758_v34 }
  0x87   : > { %895 = vmatmul.mubr.bf16.gmra.mrb[44].mxu0 %v2759_v37  ;;  %2629 = vmatmul.mubr.msk.bf16.gmra.mrb[44].mxu1 %vm718_vm2, %v2760_v38 }
 0x102   : > { %v2473_v41 = vpop.f32.mrb[0].mxu0  ;;  %v2545_v42 = vpop.f32.mrb[0].mxu1 }
 0x103   : > { %v2474_v43 = vpop.f32.mrb[1].mxu0  ;;  %v2546_v44 = vpop.f32.mrb[1].mxu1 }
 0x104   : > { %v2475_v45 = vadd.f32 %v2474_v43, %v2473_v41  ;;  %v3289_v46 = vadd.f32 %v2546_v44, %v2545_v42  ;;  %v2476_v47 = vpop.f32.mrb[2].mxu0  ;;  %v2548_v48 = vpop.f32.mrb[2].mxu1 }
 0x105   : > { %v2477_v49 = vpop.f32.mrb[3].mxu0  ;;  %v2549_v50 = vpop.f32.mrb[3].mxu1 }
 0x106   : > { %v2478_v51 = vadd.f32 %v2477_v49, %v2476_v47  ;;  %v3291_v52 = vadd.f32 %v2549_v50, %v2548_v48 }
 0x10a   : > { %v2479_v53 = vpop.f32.mrb[4].mxu0  ;;  %v2551_v54 = vpop.f32.mrb[4].mxu1 }
 0x10b   : > { %v2480_v55 = vpop.f32.mrb[5].mxu0  ;;  %v2552_v56 = vpop.f32.mrb[5].mxu1 }
 0x10c   : > { %v2481_v57 = vadd.f32 %v2480_v55, %v2479_v53  ;;  %v3293_v58 = vadd.f32 %v2552_v56, %v2551_v54  ;;  %v2482_v59 = vpop.f32.mrb[6].mxu0  ;;  %v2554_v60 = vpop.f32.mrb[6].mxu1 }
 0x10d   : > { %v2483_v61 = vpop.f32.mrb[7].mxu0  ;;  %v2555_v62 = vpop.f32.mrb[7].mxu1 }
 0x10e   : > { %v2484_v63 = vadd.f32 %v2483_v61, %v2482_v59  ;;  %v3295_v0 = vadd.f32 %v2555_v62, %v2554_v60 }
 0x112   : > { %v2485_v1 = vpop.f32.mrb[8].mxu0  ;;  %v2557_v2 = vpop.f32.mrb[8].mxu1 }
 0x113   : > { %v2486_v3 = vpop.f32.mrb[9].mxu0  ;;  %v2558_v4 = vpop.f32.mrb[9].mxu1 }
 0x114   : > { %v2487_v5 = vadd.f32 %v2486_v3, %v2485_v1  ;;  %v3297_v6 = vadd.f32 %v2558_v4, %v2557_v2  ;;  %v2488_v7 = vpop.f32.mrb[10].mxu0  ;;  %v2560_v8 = vpop.f32.mrb[10].mxu1 }
 0x115   : > { %v2489_v9 = vpop.f32.mrb[11].mxu0  ;;  %v2561_v10 = vpop.f32.mrb[11].mxu1 }
 0x116   : > { %v2490_v11 = vadd.f32 %v2489_v9, %v2488_v7  ;;  %v3299_v12 = vadd.f32 %v2561_v10, %v2560_v8 }
 0x11a   : > { %v2491_v13 = vpop.f32.mrb[12].mxu0  ;;  %v2563_v14 = vpop.f32.mrb[12].mxu1 }
 0x11b   : > { %v2492_v15 = vpop.f32.mrb[13].mxu0  ;;  %v2564_v16 = vpop.f32.mrb[13].mxu1 }
 0x11c   : > { %v2493_v17 = vadd.f32 %v2492_v15, %v2491_v13  ;;  %v3301_v18 = vadd.f32 %v2564_v16, %v2563_v14  ;;  %v2494_v19 = vpop.f32.mrb[14].mxu0  ;;  %v2566_v20 = vpop.f32.mrb[14].mxu1 }
 0x11d   : > { %v2495_v21 = vpop.f32.mrb[15].mxu0  ;;  %v2567_v22 = vpop.f32.mrb[15].mxu1 }
 0x11e   : > { %v2496_v23 = vadd.f32 %v2495_v21, %v2494_v19  ;;  %v3303_v24 = vadd.f32 %v2567_v22, %v2566_v20  ;;  %v3342_v14 = vpop.permute.xlu0 %1384 }
 0x122   : > { %v2497_v25 = vpop.f32.mrb[16].mxu0  ;;  %v2602_v26 = vpop.f32.mrb[16].mxu1 }
 0x123   : > { %v3305_v27 = vadd.f32 %v2602_v26, %v2481_v57  ;;  %v2498_v28 = vpop.f32.mrb[17].mxu0  ;;  %v969_v29 = vpop.f32.mrb[17].mxu1 }
 0x124   : > { %v2499_v30 = vadd.f32 %v2498_v28, %v2497_v25  ;;  %v3307_v31 = vadd.f32 %v2475_v45, %v969_v29  ;;  %v2500_v32 = vpop.f32.mrb[18].mxu0  ;;  %v2603_v33 = vpop.f32.mrb[18].mxu1 }
 0x125   : > { %2761 = vtanh.f32 %v3305_v27  ;;  %v3310_v34 = vadd.f32 %v2603_v33, %v2484_v63  ;;  %v2501_v35 = vpop.f32.mrb[19].mxu0  ;;  %v972_v36 = vpop.f32.mrb[19].mxu1 }
 0x126   : > { %v2502_v37 = vadd.f32 %v2501_v35, %v2500_v32  ;;  %v3312_v38 = vadd.f32 %v2478_v51, %v972_v36  ;;  %2763 = vtanh.f32 %v3307_v31  ;;  %v3354_v36 = vpop.permute.xlu1 %1388 }
 0x127   : > { %2765 = vtanh.f32 %v3310_v34 }
 0x12a   : > { %v2503_v39 = vpop.f32.mrb[20].mxu0  ;;  %v2606_v40 = vpop.f32.mrb[20].mxu1 }
 0x12b   : > { %v3316_v41 = vadd.f32 %v2606_v40, %v2493_v17  ;;  %v2504_v42 = vpop.f32.mrb[21].mxu0  ;;  %v985_v43 = vpop.f32.mrb[21].mxu1 }
 0x12c   : > { %v2505_v44 = vadd.f32 %v2504_v42, %v2503_v39  ;;  %v3318_v45 = vadd.f32 %v2487_v5, %v985_v43  ;;  %v2506_v47 = vpop.f32.mrb[22].mxu0  ;;  %v2607_v48 = vpop.f32.mrb[22].mxu1 }
 0x12d   : > { %2767 = vtanh.f32 %v3316_v41  ;;  %v3321_v49 = vadd.f32 %v2607_v48, %v2496_v23  ;;  %v2507_v50 = vpop.f32.mrb[23].mxu0  ;;  %v988_v51 = vpop.f32.mrb[23].mxu1 }
 0x12e   : > { %2769 = vtanh.f32 %v3312_v38  ;;  %v2508_v53 = vadd.f32 %v2507_v50, %v2506_v47  ;;  %v3324_v54 = vadd.f32 %v2490_v11, %v988_v51  ;;  %v3358_v39 = vpop.permute.xlu0 %1386 }
 0x12f   : > { %v2762_v55 = vpop.eup %2761  ;;  %2771 = vtanh.f32 %v3318_v45 }
 0x130   : > { %1548 = vrot.lane.b32.xlu0 %v2762_v55, %s3042_s21  ;;  %2773 = vtanh.f32 %v3321_v49  ;;  %v2764_v59 = vpop.eup %2763 }
 0x131   : > { %v2766_v63 = vpop.eup %2765  ;;  %2775 = vtanh.f32 %v3324_v54 }
 0x132   : > { %v2509_v56 = vpop.f32.mrb[24].mxu0  ;;  %v2610_v57 = vpop.f32.mrb[24].mxu1  ;;  %1550 = vrot.lane.b32.xlu1 %v2766_v63, %s3042_s21 }
 0x133   : > { %v3329_v60 = vadd.f32 %v2610_v57, %v2505_v44  ;;  %v2510_v61 = vpop.f32.mrb[25].mxu0  ;;  %v1001_v62 = vpop.f32.mrb[25].mxu1 }
 0x134   : > { %v2511_v1 = vadd.f32 %v2510_v61, %v2509_v56  ;;  %v3331_v2 = vadd.f32 %v2499_v30, %v1001_v62  ;;  %v2512_v3 = vpop.f32.mrb[26].mxu0  ;;  %v2611_v4 = vpop.f32.mrb[26].mxu1  ;;  %1544 = vrot.lane.b32.xlu0 %v2764_v59, %s3042_s21 }
 0x135   : > { %v3335_v5 = vadd.f32 %v2611_v4, %v2508_v53  ;;  %v2513_v7 = vpop.f32.mrb[27].mxu0  ;;  %v1004_v8 = vpop.f32.mrb[27].mxu1  ;;  %2777 = vtanh.f32 %v3329_v60 }
 0x136   : > { %v2514_v9 = vadd.f32 %v2513_v7, %v2512_v3  ;;  %v3338_v11 = vadd.f32 %v2502_v37, %v1004_v8  ;;  %2779 = vtanh.f32 %v3331_v2  ;;  %v3368_v62 = vpop.permute.xlu1 %1390  ;;  %v3370_v63 = vpop.permute.xlu0 %1392 }
 0x137   : > { %v2768_v10 = vpop.eup %2767  ;;  %2781 = vtanh.f32 %v3335_v5 }
 0x138   : > { %v2770_v13 = vpop.eup %2769  ;;  %1556 = vrot.lane.b32.xlu0 %v2768_v10, %s3042_s21  ;;  %2783 = vtanh.f32 %v3338_v11 }
 0x139   : > { %1546 = vrot.lane.b32.xlu1 %v2770_v13, %s3042_s21  ;;  %v2772_v17 = vpop.eup %2771 }
 0x13a   : > { %v2515_v15 = vpop.f32.mrb[28].mxu0  ;;  %v2614_v16 = vpop.f32.mrb[28].mxu1 }
 0x13b   : > { %v2516_v19 = vpop.f32.mrb[29].mxu0  ;;  %v1017_v20 = vpop.f32.mrb[29].mxu1 }
 0x13c   : > { %v2774_v21 = vpop.eup %2773  ;;  %v2517_v22 = vadd.f32 %v2516_v19, %v2515_v15  ;;  %v3345_v23 = vadd.f32 %v2511_v1, %v1017_v20  ;;  %v2518_v25 = vpop.f32.mrb[30].mxu0  ;;  %1552 = vrot.lane.b32.xlu0 %v2772_v17, %s3042_s21 }
 0x13d   : > { %v2615_v26 = vpop.f32.mrb[30].mxu1  ;;  %1558 = vrot.lane.b32.xlu1 %v2774_v21, %s3042_s21  ;;  %v2519_v28 = vpop.f32.mrb[31].mxu0 }
 0x13e   : > { %v1020_v29 = vpop.f32.mrb[31].mxu1  ;;  %v3349_v30 = vadd.f32 %v2614_v16, %v2517_v22  ;;  %v2520_v32 = vadd.f32 %v2519_v28, %v2518_v25  ;;  %v2776_v35 = vpop.eup %2775  ;;  %2785 = vtanh.f32 %v3345_v23 }
 0x13f   : > { %v3352_v33 = vadd.f32 %v2514_v9, %v1020_v29  ;;  %v2778_v47 = vpop.eup %2777  ;;  %v3385_v22 = vpop.permute.xlu1 %1394 }
 0x140   : > { %v3356_v37 = vadd.f32 %v2615_v26, %v2520_v32  ;;  %1564 = vrot.lane.b32.xlu0 %v2778_v47, %s3042_s21  ;;  %v2780_v61 = vpop.eup %2779  ;;  %2787 = vtanh.f32 %v3349_v30  ;;  %v3387_v25 = vpop.permute.xlu0 %1396 }
 0x141   : > { %1554 = vrot.lane.b32.xlu1 %v2776_v35, %s3042_s21  ;;  %v2782_v8 = vpop.eup %2781  ;;  %2789 = vtanh.f32 %v3352_v33 }
 0x142   : > { %v2521_v40 = vpop.f32.mrb[32].mxu0  ;;  %v2618_v42 = vpop.f32.mrb[32].mxu1  ;;  %2791 = vtanh.f32 %v3356_v37 }
 0x143   : > { %v2522_v43 = vpop.f32.mrb[33].mxu0  ;;  %v1033_v44 = vpop.f32.mrb[33].mxu1 }
 0x144   : > { %v2523_v48 = vadd.f32 %v2522_v43, %v2521_v40  ;;  %v2524_v50 = vpop.f32.mrb[34].mxu0  ;;  %v2619_v51 = vpop.f32.mrb[34].mxu1  ;;  %1560 = vrot.lane.b32.xlu0 %v2780_v61, %s3042_s21 }
 0x145   : > { %v2525_v53 = vpop.f32.mrb[35].mxu0  ;;  %v1036_v55 = vpop.f32.mrb[35].mxu1  ;;  %1566 = vrot.lane.b32.xlu1 %v2782_v8, %s3042_s21 }
 0x146   : > { %v3364_v56 = vadd.f32 %v2523_v48, %v1033_v44  ;;  %v2526_v57 = vadd.f32 %v2525_v53, %v2524_v50  ;;  %v2784_v20 = vpop.eup %2783  ;;  %v3408_v61 = vpop.permute.xlu1 %1398 }
 0x148   : > { %v3366_v59 = vadd.f32 %v2526_v57, %v1036_v55  ;;  %2793 = vtanh.f32 %v3364_v56  ;;  %v2786_v40 = vpop.eup %2785 }
 0x149   : > { %1562 = vrot.lane.b32.xlu1 %v2784_v20, %s3042_s21  ;;  %1568 = vrot.lane.b32.xlu0 %v2786_v40, %s3042_s21 }
 0x14a   : > { %v2527_v1 = vpop.f32.mrb[36].mxu0  ;;  %v3374_v3 = vpop.f32.mrb[36].mxu1  ;;  %2795 = vtanh.f32 %v3366_v59 }
 0x14b   : > { %v2528_v4 = vpop.f32.mrb[37].mxu0  ;;  %v1049_v7 = vpop.f32.mrb[37].mxu1 }
 0x14c   : > { %v2529_v9 = vadd.f32 %v2528_v4, %v2527_v1  ;;  %v2530_v10 = vpop.f32.mrb[38].mxu0  ;;  %v3376_v13 = vpop.f32.mrb[38].mxu1 }
 0x14d   : > { %v2531_v15 = vpop.f32.mrb[39].mxu0  ;;  %v1052_v16 = vpop.f32.mrb[39].mxu1 }
 0x14e   : > { %v3380_v17 = vadd.f32 %v2618_v42, %v2529_v9  ;;  %v2532_v19 = vadd.f32 %v2531_v15, %v2530_v10  ;;  %v2788_v57 = vpop.eup %2787  ;;  %v3410_v1 = vpop.permute.xlu0 %1400 }
 0x14f   : > { %1572 = vrot.lane.b32.xlu0 %v2788_v57, %s3042_s21 }
 0x150   : > { %v3383_v21 = vadd.f32 %v2619_v51, %v2532_v19  ;;  %2797 = vtanh.f32 %v3380_v17 }
 0x152   : > { %v2533_v26 = vpop.f32.mrb[40].mxu0  ;;  %v2626_v28 = vpop.f32.mrb[40].mxu1  ;;  %2799 = vtanh.f32 %v3383_v21 }
 0x153   : > { %v3393_v29 = vadd.f32 %v2626_v28, %v3293_v58  ;;  %v2534_v32 = vpop.f32.mrb[41].mxu0  ;;  %v1065_v35 = vpop.f32.mrb[41].mxu1 }
 0x154   : > { %v2535_v42 = vadd.f32 %v2534_v32, %v2533_v26  ;;  %v3396_v43 = vadd.f32 %v3289_v46, %v1065_v35  ;;  %v2536_v44 = vpop.f32.mrb[42].mxu0  ;;  %v2627_v47 = vpop.f32.mrb[42].mxu1 }
 0x155   : > { %v3401_v48 = vadd.f32 %v2627_v47, %v3295_v0  ;;  %v2537_v50 = vpop.f32.mrb[43].mxu0  ;;  %v1068_v51 = vpop.f32.mrb[43].mxu1  ;;  %2801 = vtanh.f32 %v3393_v29 }
 0x156   : > { %v3403_v58 = vadd.f32 %v2535_v42, %v1049_v7  ;;  %v2538_v53 = vadd.f32 %v2537_v50, %v2536_v44  ;;  %v3406_v55 = vadd.f32 %v3291_v52, %v1068_v51  ;;  %v2790_v46 = vpop.eup %2789  ;;  %v3441_v47 = vpop.permute.xlu0 %1404  ;;  %2803 = vtanh.f32 %v3396_v43 }
 0x157   : > { %1570 = vrot.lane.b32.xlu1 %v2790_v46, %s3042_s21  ;;  %v2792_v10 = vpop.eup %2791  ;;  %2805 = vtanh.f32 %v3401_v48 }
 0x158   : > { %v3414_v0 = vadd.f32 %v2538_v53, %v1052_v16  ;;  %v2794_v16 = vpop.eup %2793  ;;  %2807 = vtanh.f32 %v3403_v58 }
 0x159   : > { %1576 = vrot.lane.b32.xlu0 %v2794_v16, %s3042_s21  ;;  %v2796_v42 = vpop.eup %2795  ;;  %2809 = vtanh.f32 %v3406_v55 }
 0x15a   : > { %v2539_v4 = vpop.f32.mrb[44].mxu0  ;;  %v2630_v7 = vpop.f32.mrb[44].mxu1 }
 0x15b   : > { %v3418_v8 = vadd.f32 %v2630_v7, %v3301_v18  ;;  %v2540_v52 = vpop.f32.mrb[45].mxu0  ;;  %v1081_v9 = vpop.f32.mrb[45].mxu1  ;;  %1574 = vrot.lane.b32.xlu1 %v2792_v10, %s3042_s21 }
 0x15c   : > { %v2541_v15 = vadd.f32 %v2540_v52, %v2539_v4  ;;  %v3422_v19 = vadd.f32 %v3297_v6, %v1081_v9  ;;  %v2542_v20 = vpop.f32.mrb[46].mxu0  ;;  %v2631_v26 = vpop.f32.mrb[46].mxu1 }
 0x15d   : > { %v3425_v28 = vadd.f32 %v2631_v26, %v3303_v24  ;;  %v2543_v32 = vpop.f32.mrb[47].mxu0  ;;  %v1084_v35 = vpop.f32.mrb[47].mxu1  ;;  %2811 = vtanh.f32 %v3418_v8 }
 0x15e   : > { %v3430_v18 = vadd.f32 %v3374_v3, %v2541_v15  ;;  %v2544_v40 = vadd.f32 %v2543_v32, %v2542_v20  ;;  %v3434_v6 = vadd.f32 %v3299_v12, %v1084_v35  ;;  %v3439_v24 = vpop.permute.xlu1 %1402  ;;  %v2798_v50 = vpop.eup %2797  ;;  %2813 = vtanh.f32 %v3414_v0 }
 0x15f   : > { %1578 = vrot.lane.b32.xlu1 %v2796_v42, %s3042_s21  ;;  %1580 = vrot.lane.b32.xlu0 %v2798_v50, %s3042_s21  ;;  %v2800_v3 = vpop.eup %2799  ;;  %v3450_v12 = vpop.permute.xlu0 %1408  ;;  %2815 = vtanh.f32 %v3422_v19  ;;  %v2423_v42 = vmul.f32 -1.442695, %v3305_v27  ;;  %v2422_v27 = vmul.f32 -1.442695, %v3312_v38 }
 0x160   : > { %v3437_v44 = vadd.f32 %v3376_v13, %v2544_v40  ;;  %v2802_v13 = vpop.eup %2801  ;;  %2817 = vtanh.f32 %v3425_v28 }
 0x161   : > { %v2804_v46 = vpop.eup %2803  ;;  %2819 = vtanh.f32 %v3430_v18 }
 0x162   : > { %v3446_v51 = vpop.permute.xlu1 %1406  ;;  %v2806_v4 = vpop.eup %2805  ;;  %2821 = vtanh.f32 %v3434_v6 }
 0x163   : > { %1582 = vrot.lane.b32.xlu1 %v2800_v3, %s3042_s21  ;;  %1596 = vrot.lane.b32.xlu0 %v2802_v13, %s3042_s21  ;;  %v3457_v57 = vpop.permute.xlu0 %1412  ;;  %v2808_v7 = vpop.eup %2807  ;;  %2823 = vtanh.f32 %v3437_v44 }
 0x164   : > { %v2810_v10 = vpop.eup %2809  ;;  %2825 = vpow2.f32 %v2423_v42  ;;  %v2425_v42 = vmul.f32 -1.442695, %v3318_v45 }
 0x166   : > { %v3454_v53 = vpop.permute.xlu1 %1410 }
 0x167   : > { %1592 = vrot.lane.b32.xlu0 %v2804_v46, %s3042_s21  ;;  %1598 = vrot.lane.b32.xlu1 %v2806_v4, %s3042_s21  ;;  %v3465_v9 = vpop.permute.xlu0 %1416  ;;  %v2812_v26 = vpop.eup %2811  ;;  %v2421_v46 = vmul.f32 -1.442695, %v3307_v31 }
 0x168   : > { %v2814_v16 = vpop.eup %2813 }
 0x169   : > { %v2816_v40 = vpop.eup %2815  ;;  %2827 = vpow2.f32 %v2421_v46 }
 0x16a   : > { %v3463_v52 = vpop.permute.xlu1 %1414  ;;  %v2818_v50 = vpop.eup %2817 }
 0x16b   : > { %1584 = vrot.lane.b32.xlu0 %v2808_v7, %s3042_s21  ;;  %1594 = vrot.lane.b32.xlu1 %v2810_v10, %s3042_s21  ;;  %v3473_v20 = vpop.permute.xlu0 %1420  ;;  %v2820_v3 = vpop.eup %2819  ;;  %v2424_v7 = vmul.f32 -1.442695, %v3310_v34  ;;  %v2428_v34 = vmul.f32 -1.442695, %v3321_v49 }
 0x16c   : > { %v2822_v10 = vpop.eup %2821 }
 0x16d   : > { %2829 = vpow2.f32 %v2424_v7  ;;  %v2824_v31 = vpop.eup %2823  ;;  %v2426_v7 = vmul.f32 -1.442695, %v3324_v54  ;;  %v2429_v54 = vmul.f32 -1.442695, %v3331_v2 }
 0x16e   : > { %v3469_v15 = vpop.permute.xlu1 %1418  ;;  %2831 = vpow2.f32 %v2422_v27 }
 0x16f   : > { %1604 = vrot.lane.b32.xlu0 %v2812_v26, %s3042_s21  ;;  %1586 = vrot.lane.b32.xlu1 %v2814_v16, %s3042_s21  ;;  %v3481_v35 = vpop.permute.xlu0 %1424  ;;  %v2427_v26 = vmul.f32 -1.442695, %v3316_v41 }
 0x171   : > { %2833 = vpow2.f32 %v2427_v26 }
 0x172   : > { %v3478_v32 = vpop.permute.xlu1 %1422  ;;  %2835 = vpow2.f32 %v2425_v42 }
 0x173   : > { %1600 = vrot.lane.b32.xlu0 %v2816_v40, %s3042_s21  ;;  %1606 = vrot.lane.b32.xlu1 %v2818_v50, %s3042_s21  ;;  %v3490_v4 = vpop.permute.xlu0 %1428  ;;  %v2826_v50 = vpop.eup %2825  ;;  %2837 = vpow2.f32 %v2428_v34 }
 0x174   : > { %4090 = vst [vmem:[#allocation3_spill] sm:$0xff] %v3490_v4  ;;  %v1194_v46 = vadd.f32 1.0, %v2826_v50 }
 0x176   : > { %v3486_v13 = vpop.permute.xlu1 %1426  ;;  %2839 = vrcp.f32 %v1194_v46 }
 0x177   : > { %4089 = vst [vmem:[#allocation2_spill] sm:$0xff] %v3486_v13  ;;  %1588 = vrot.lane.b32.xlu0 %v2820_v3, %s3042_s21  ;;  %1602 = vrot.lane.b32.xlu1 %v2822_v10, %s3042_s21  ;;  %v3499_v40 = vpop.permute.xlu0 %1432  ;;  %v2828_v3 = vpop.eup %2827  ;;  %2841 = vpow2.f32 %v2426_v7 }
 0x178   : > { %v2830_v10 = vpop.eup %2829  ;;  %v1192_v27 = vadd.f32 1.0, %v2828_v3 }
 0x179   : > { %v2832_v45 = vpop.eup %2831  ;;  %v1195_v4 = vadd.f32 1.0, %v2830_v10 }
 0x17a   : > { %v3496_v16 = vpop.permute.xlu1 %1430  ;;  %2843 = vrcp.f32 %v1192_v27  ;;  %v1193_v42 = vadd.f32 1.0, %v2832_v45 }
 0x17b   : > { %4091 = vst [vmem:[#allocation4_spill] sm:$0xff] %v3496_v16  ;;  %1590 = vrot.lane.b32.xlu1 %v2824_v31, %s3042_s21  ;;  %v3506_v41 = vpop.permute.xlu0 %1436  ;;  %v2431_v31 = vmul.f32 -1.442695, %v3329_v60  ;;  %v2834_v16 = vpop.eup %2833  ;;  %v2432_v60 = vmul.f32 -1.442695, %v3335_v5 }
 0x17c   : > { %v1198_v13 = vadd.f32 1.0, %v2834_v16  ;;  %v2836_v34 = vpop.eup %2835 }
 0x17d   : > { %2845 = vpow2.f32 %v2431_v31  ;;  %v2838_v3 = vpop.eup %2837  ;;  %v1196_v46 = vadd.f32 1.0, %v2836_v34 }
 0x17e   : > { %v3504_v38 = vpop.permute.xlu1 %1434  ;;  %2847 = vrcp.f32 %v1195_v4  ;;  %v1199_v10 = vadd.f32 1.0, %v2838_v3  ;;  %v2430_v4 = vmul.f32 -1.442695, %v3338_v11  ;;  %v2433_v11 = vmul.f32 -1.442695, %v3345_v23 }
 0x17f   : > { %4092 = vst [vmem:[#allocation5_spill] sm:$0xff] %v3504_v38  ;;  %v3512_v49 = vpop.permute.xlu0 %1440  ;;  %2849 = vrcp.f32 %v1193_v42 }
 0x180   : > { %4093 = vst [vmem:[#allocation6_spill] sm:$0xff] %v3512_v49  ;;  %2851 = vrcp.f32 %v1198_v13  ;;  %v3520_v7 = vpop.eup %2839 }
 0x181   : > { %2853 = vpow2.f32 %v2429_v54  ;;  %v2842_v27 = vpop.eup %2841 }
 0x182   : > { %v3509_v26 = vpop.permute.xlu1 %1438  ;;  %2855 = vpow2.f32 %v2432_v60  ;;  %v1197_v13 = vadd.f32 1.0, %v2842_v27 }
 0x183   : > { %v3517_v38 = vpop.permute.xlu0 %1444  ;;  %2857 = vrcp.f32 %v1196_v46 }
 0x184   : > { %4095 = vst [vmem:[#allocation8_spill] sm:$0xff] %v3517_v38  ;;  %v3526_v31 = vpop.eup %2843  ;;  %2859 = vrcp.f32 %v1199_v10 }
 0x185   : > { %2861 = vpow2.f32 %v2430_v4  ;;  %v2435_v4 = vmul.f32 -1.442695, %v3349_v30  ;;  %v2436_v30 = vmul.f32 -1.442695, %v3356_v37 }
 0x186   : > { %v3515_v50 = vpop.permute.xlu1 %1442  ;;  %2863 = vrcp.f32 %v1197_v13 }
 0x187   : > { %4094 = vst [vmem:[#allocation7_spill] sm:$0xff] %v3515_v50  ;;  %v2846_v5 = vpop.eup %2845  ;;  %2865 = vpow2.f32 %v2433_v11 }
 0x188   : > { %v3529_v34 = vpop.eup %2847  ;;  %v1202_v46 = vadd.f32 1.0, %v2846_v5  ;;  %v2434_v5 = vmul.f32 -1.442695, %v3352_v33 }
 0x18a   : > { %v3523_v2 = vpop.permute.xlu1 %1446  ;;  %2867 = vrcp.f32 %v1202_v46 }
 0x18b   : > { %4096 = vst [vmem:[#allocation9_spill] sm:$0xff] %v3523_v2  ;;  %2869 = vpow2.f32 %v2435_v4 }
 0x18c   : > { %2871 = vpow2.f32 %v2434_v5 }
 0x1a2   : > { %v1549_v16 = vpop.permute.xlu0 %1548 }
 0x1a3   : > { %v1642_v45 = vmul.f32 %v3520_v7, %v1549_v16  ;;  %v3534_v16 = vpop.eup %2849 }
 0x1a4   : > { %v1551_v54 = vpop.permute.xlu1 %1550  ;;  %v3537_v10 = vpop.eup %2851 }
 0x1a5   : > { %1708 = vrot.lane.b32.xlu0 %v1642_v45, %s3042_s21  ;;  %v1643_v60 = vmul.f32 %v3529_v34, %v1551_v54  ;;  %v2854_v45 = vpop.eup %2853 }
 0x1a6   : > { %v1545_v42 = vpop.permute.xlu0 %1544  ;;  %v2856_v54 = vpop.eup %2855  ;;  %v1200_v13 = vadd.f32 1.0, %v2854_v45 }
 0x1a7   : > { %v1640_v3 = vmul.f32 %v3526_v31, %v1545_v42  ;;  %1710 = vrot.lane.b32.xlu1 %v1643_v60, %s3042_s21 }
 0x1a8   : > { %2873 = vrcp.f32 %v1200_v13 }
 0x1a9   : > { %1704 = vrot.lane.b32.xlu0 %v1640_v3, %s3042_s21  ;;  %v3545_v3 = vpop.eup %2857  ;;  %2875 = vpow2.f32 %v2436_v30 }
 0x1aa   : > { %v1557_v27 = vpop.permute.xlu0 %1556  ;;  %v3548_v2 = vpop.eup %2859 }
 0x1ab   : > { %v1547_v50 = vpop.permute.xlu1 %1546  ;;  %v1646_v42 = vmul.f32 %v3537_v10, %v1557_v27  ;;  %v1203_v27 = vadd.f32 1.0, %v2856_v54  ;;  %v2862_v33 = vpop.eup %2861 }
 0x1ac   : > { %v1641_v23 = vmul.f32 %v3534_v16, %v1547_v50  ;;  %v3556_v45 = vpop.eup %2863  ;;  %v1201_v37 = vadd.f32 1.0, %v2862_v33 }
 0x1ad   : > { %1716 = vrot.lane.b32.xlu0 %v1646_v42, %s3042_s21  ;;  %v2437_v42 = vmul.f32 -1.442695, %v3364_v56  ;;  %2877 = vrcp.f32 %v1203_v27  ;;  %v2439_v56 = vmul.f32 -1.442695, %v3380_v17  ;;  %v2440_v27 = vmul.f32 -1.442695, %v3383_v21 }
 0x1ae   : > { %1706 = vrot.lane.b32.xlu1 %v1641_v23, %s3042_s21  ;;  %v1553_v60 = vpop.permute.xlu0 %1552  ;;  %v2438_v23 = vmul.f32 -1.442695, %v3366_v59 }
 0x1af   : > { %v1559_v11 = vpop.permute.xlu1 %1558  ;;  %v1644_v50 = vmul.f32 %v3545_v3, %v1553_v60  ;;  %2879 = vpow2.f32 %v2437_v42  ;;  %v2866_v60 = vpop.eup %2865 }
 0x1b0   : > { %v1647_v46 = vmul.f32 %v3548_v2, %v1559_v11  ;;  %v3560_v5 = vpop.eup %2867  ;;  %2881 = vrcp.f32 %v1201_v37 }
 0x1b1   : > { %1712 = vrot.lane.b32.xlu0 %v1644_v50, %s3042_s21  ;;  %v2870_v30 = vpop.eup %2869  ;;  %v1204_v50 = vadd.f32 1.0, %v2866_v60  ;;  %2883 = vpow2.f32 %v2438_v23 }
 0x1b2   : > { %1718 = vrot.lane.b32.xlu1 %v1647_v46, %s3042_s21  ;;  %v1565_v11 = vpop.permute.xlu0 %1564  ;;  %v2872_v59 = vpop.eup %2871  ;;  %2885 = vpow2.f32 %v2439_v56  ;;  %v1206_v33 = vadd.f32 1.0, %v2870_v30 }
 0x1b3   : > { %v1555_v4 = vpop.permute.xlu1 %1554  ;;  %v1650_v13 = vmul.f32 %v3560_v5, %v1565_v11  ;;  %v3567_v46 = vpop.eup %2873  ;;  %2887 = vrcp.f32 %v1204_v50  ;;  %v1205_v60 = vadd.f32 1.0, %v2872_v59  ;;  %v2445_v50 = vmul.f32 -1.442695, %v3396_v43 }
 0x1b4   : > { %v1645_v54 = vmul.f32 %v3556_v45, %v1555_v4  ;;  %v2876_v17 = vpop.eup %2875  ;;  %v2447_v4 = vmul.f32 -1.442695, %v3393_v29  ;;  %2889 = vpow2.f32 %v2440_v27 }
 0x1b5   : > { %1724 = vrot.lane.b32.xlu0 %v1650_v13, %s3042_s21  ;;  %2891 = vrcp.f32 %v1206_v33  ;;  %v1207_v11 = vadd.f32 1.0, %v2876_v17  ;;  %v2448_v33 = vmul.f32 -1.442695, %v3401_v48 }
 0x1b6   : > { %1714 = vrot.lane.b32.xlu1 %v1645_v54, %s3042_s21  ;;  %v1561_v42 = vpop.permute.xlu0 %1560  ;;  %2893 = vpow2.f32 %v2447_v4  ;;  %v2441_v4 = vmul.f32 -1.442695, %v3403_v58  ;;  %v2446_v58 = vmul.f32 -1.442695, %v3406_v55 }
 0x1b7   : > { %v1648_v37 = vmul.f32 %v3567_v46, %v1561_v42  ;;  %v3571_v54 = vpop.eup %2877  ;;  %v1567_v21 = vpop.permute.xlu1 %1566  ;;  %2895 = vrcp.f32 %v1205_v60 }
 0x1b8   : > { %v1651_v56 = vmul.f32 %v3571_v54, %v1567_v21  ;;  %2897 = vrcp.f32 %v1207_v11 }
 0x1b9   : > { %v2880_v23 = vpop.eup %2879  ;;  %1720 = vrot.lane.b32.xlu0 %v1648_v37, %s3042_s21 }
 0x1ba   : > { %v3575_v13 = vpop.eup %2881  ;;  %v1208_v30 = vadd.f32 1.0, %v2880_v23  ;;  %1726 = vrot.lane.b32.xlu1 %v1651_v56, %s3042_s21 }
 0x1bb   : > { %v2884_v29 = vpop.eup %2883  ;;  %v1563_v59 = vpop.permute.xlu1 %1562 }
 0x1bc   : > { %v1649_v27 = vmul.f32 %v3575_v13, %v1563_v59  ;;  %v2886_v42 = vpop.eup %2885  ;;  %2899 = vrcp.f32 %v1208_v30  ;;  %v1209_v37 = vadd.f32 1.0, %v2884_v29  ;;  %v1569_v60 = vpop.permute.xlu0 %1568 }
 0x1bd   : > { %v3582_v17 = vpop.eup %2887  ;;  %2901 = vpow2.f32 %v2445_v50  ;;  %v1210_v21 = vadd.f32 1.0, %v2886_v42 }
 0x1be   : > { %1722 = vrot.lane.b32.xlu1 %v1649_v27, %s3042_s21  ;;  %v2890_v23 = vpop.eup %2889  ;;  %v1652_v43 = vmul.f32 %v3582_v17, %v1569_v60  ;;  %2903 = vpow2.f32 %v2448_v33 }
 0x1bf   : > { %v3586_v56 = vpop.eup %2891  ;;  %2905 = vrcp.f32 %v1209_v37  ;;  %v1211_v11 = vadd.f32 1.0, %v2890_v23 }
 0x1c0   : > { %1728 = vrot.lane.b32.xlu0 %v1652_v43, %s3042_s21  ;;  %v2894_v48 = vpop.eup %2893  ;;  %2907 = vpow2.f32 %v2441_v4  ;;  %v2442_v4 = vmul.f32 -1.442695, %v3414_v0 }
 0x1c1   : > { %v1573_v30 = vpop.permute.xlu0 %1572  ;;  %v3589_v29 = vpop.eup %2895  ;;  %2909 = vrcp.f32 %v1210_v21  ;;  %v1218_v42 = vadd.f32 1.0, %v2894_v48 }
 0x1c2   : > { %v1654_v59 = vmul.f32 %v3586_v56, %v1573_v30  ;;  %v3595_v33 = vpop.eup %2897  ;;  %2911 = vrcp.f32 %v1211_v11 }
 0x1c3   : > { %2913 = vpow2.f32 %v2446_v58  ;;  %v2449_v58 = vmul.f32 -1.442695, %v3422_v19 }
 0x1c4   : > { %1732 = vrot.lane.b32.xlu0 %v1654_v59, %s3042_s21  ;;  %2915 = vrcp.f32 %v1218_v42 }
 0x1c5   : > { %2917 = vpow2.f32 %v2442_v4  ;;  %v2443_v4 = vmul.f32 -1.442695, %v3430_v18 }
 0x1c6   : > { %v3598_v37 = vpop.eup %2899 }
 0x1c7   : > { %v2902_v23 = vpop.eup %2901 }
 0x1c8   : > { %v2904_v48 = vpop.eup %2903  ;;  %v1216_v30 = vadd.f32 1.0, %v2902_v23 }
 0x1c9   : > { %v1571_v50 = vpop.permute.xlu1 %1570  ;;  %v3605_v11 = vpop.eup %2905 }
 0x1ca   : > { %v1653_v27 = vmul.f32 %v3589_v29, %v1571_v50  ;;  %v2908_v0 = vpop.eup %2907  ;;  %2919 = vrcp.f32 %v1216_v30 }
 0x1cb   : > { %v1577_v55 = vpop.permute.xlu0 %1576  ;;  %2921 = vpow2.f32 %v2449_v58 }
 0x1cc   : > { %1730 = vrot.lane.b32.xlu1 %v1653_v27, %s3042_s21  ;;  %v1656_v43 = vmul.f32 %v3598_v37, %v1577_v55  ;;  %v3609_v27 = vpop.eup %2909 }
 0x1cd   : > { %v1575_v60 = vpop.permute.xlu1 %1574 }
 0x1ce   : > { %v1655_v21 = vmul.f32 %v3595_v33, %v1575_v60  ;;  %1736 = vrot.lane.b32.xlu0 %v1656_v43, %s3042_s21  ;;  %v1219_v60 = vadd.f32 1.0, %v2904_v48  ;;  %v3613_v43 = vpop.eup %2911 }
 0x1cf   : > { %v2914_v19 = vpop.eup %2913 }
 0x1d0   : > { %1734 = vrot.lane.b32.xlu1 %v1655_v21, %s3042_s21  ;;  %v1212_v21 = vadd.f32 1.0, %v2908_v0  ;;  %2923 = vrcp.f32 %v1219_v60  ;;  %v3618_v48 = vpop.eup %2915  ;;  %v1217_v0 = vadd.f32 1.0, %v2914_v19 }
 0x1d1   : > { %v1579_v50 = vpop.permute.xlu1 %1578  ;;  %v1581_v55 = vpop.permute.xlu0 %1580 }
 0x1d2   : > { %v1657_v59 = vmul.f32 %v3605_v11, %v1579_v50  ;;  %v1658_v42 = vmul.f32 %v3609_v27, %v1581_v55  ;;  %2925 = vrcp.f32 %v1212_v21  ;;  %v2918_v58 = vpop.eup %2917  ;;  %v2450_v55 = vmul.f32 -1.442695, %v3434_v6 }
 0x1d3   : > { %2927 = vpow2.f32 %v2443_v4  ;;  %v1213_v60 = vadd.f32 1.0, %v2918_v58  ;;  %v2444_v21 = vmul.f32 -1.442695, %v3437_v44  ;;  %v2452_v6 = vmul.f32 -1.442695, %v3425_v28 }
 0x1d4   : > { %1738 = vrot.lane.b32.xlu1 %v1657_v59, %s3042_s21  ;;  %1740 = vrot.lane.b32.xlu0 %v1658_v42, %s3042_s21  ;;  %v2451_v59 = vmul.f32 -1.442695, %v3418_v8  ;;  %v3625_v42 = vpop.eup %2919 }
 0x1d5   : > { %v1583_v23 = vpop.permute.xlu1 %1582  ;;  %v1597_v30 = vpop.permute.xlu0 %1596 }
 0x1d6   : > { %v1659_v50 = vmul.f32 %v3613_v43, %v1583_v23  ;;  %v1666_v18 = vmul.f32 %v3618_v48, %v1597_v30  ;;  %2929 = vpow2.f32 %v2451_v59  ;;  %v2922_v23 = vpop.eup %2921 }
 0x1d7   : > { %2931 = vrcp.f32 %v1217_v0  ;;  %v1220_v0 = vadd.f32 1.0, %v2922_v23 }
 0x1d8   : > { %1742 = vrot.lane.b32.xlu1 %v1659_v50, %s3042_s21  ;;  %1756 = vrot.lane.b32.xlu0 %v1666_v18, %s3042_s21  ;;  %2933 = vpow2.f32 %v2450_v55 }
 0x1d9   : > { %v1593_v8 = vpop.permute.xlu0 %1592  ;;  %v1599_v50 = vpop.permute.xlu1 %1598  ;;  %2935 = vrcp.f32 %v1213_v60 }
 0x1da   : > { %v1664_v19 = vmul.f32 %v3625_v42, %v1593_v8  ;;  %v3629_v4 = vpop.eup %2923  ;;  %2937 = vpow2.f32 %v2444_v21 }
 0x1db   : > { %v1667_v30 = vmul.f32 %v3629_v4, %v1599_v50  ;;  %2939 = vpow2.f32 %v2452_v6 }
 0x1dc   : > { %1752 = vrot.lane.b32.xlu0 %v1664_v19, %s3042_s21  ;;  %v3634_v59 = vpop.eup %2925  ;;  %2941 = vrcp.f32 %v1220_v0 }
 0x1dd   : > { %v1585_v44 = vpop.permute.xlu0 %1584  ;;  %v2928_v18 = vpop.eup %2927  ;;  %1758 = vrot.lane.b32.xlu1 %v1667_v30, %s3042_s21 }
 0x1de   : > { %v1660_v58 = vmul.f32 %v3634_v59, %v1585_v44  ;;  %v1214_v60 = vadd.f32 1.0, %v2928_v18  ;;  %v1595_v8 = vpop.permute.xlu1 %1594 }
 0x1e0   : > { %1744 = vrot.lane.b32.xlu0 %v1660_v58, %s3042_s21  ;;  %v2930_v55 = vpop.eup %2929  ;;  %2943 = vrcp.f32 %v1214_v60 }
 0x1e1   : > { %v3639_v28 = vpop.eup %2931  ;;  %v1222_v23 = vadd.f32 1.0, %v2930_v55  ;;  %v1605_v21 = vpop.permute.xlu0 %1604 }
 0x1e2   : > { %4097 = vst [vmem:[#allocation10_spill] sm:$0xff] %v3639_v28  ;;  %v2934_v19 = vpop.eup %2933  ;;  %v1665_v50 = vmul.f32 %v3639_v28, %v1595_v8  ;;  %v1587_v6 = vpop.permute.xlu1 %1586 }
 0x1e3   : > { %v3643_v30 = vpop.eup %2935  ;;  %v1221_v44 = vadd.f32 1.0, %v2934_v19  ;;  %2945 = vrcp.f32 %v1222_v23 }
 0x1e4   : > { %1754 = vrot.lane.b32.xlu1 %v1665_v50, %s3042_s21  ;;  %v2938_v49 = vpop.eup %2937  ;;  %v1661_v58 = vmul.f32 %v3643_v30, %v1587_v6 }
 0x1e5   : > { %v2940_v0 = vpop.eup %2939  ;;  %v1215_v18 = vadd.f32 1.0, %v2938_v49  ;;  %2947 = vrcp.f32 %v1221_v44  ;;  %v1601_v55 = vpop.permute.xlu0 %1600 }
 0x1e6   : > { %v3647_v38 = vpop.eup %2941  ;;  %v1223_v8 = vadd.f32 1.0, %v2940_v0  ;;  %v1607_v50 = vpop.permute.xlu1 %1606 }
 0x1e7   : > { %v1668_v60 = vmul.f32 %v3647_v38, %v1601_v55  ;;  %2949 = vrcp.f32 %v1215_v18 }
 0x1e8   : > { %1746 = vrot.lane.b32.xlu1 %v1661_v58, %s3042_s21  ;;  %2951 = vrcp.f32 %v1223_v8 }
 0x1e9   : > { %1760 = vrot.lane.b32.xlu0 %v1668_v60, %s3042_s21  ;;  %v1589_v28 = vpop.permute.xlu0 %1588 }
 0x1ea   : > { %v3651_v19 = vpop.eup %2943  ;;  %v1603_v58 = vpop.permute.xlu1 %1602 }
 0x1eb   : > { %v1662_v23 = vmul.f32 %v3651_v19, %v1589_v28 }
 0x1ed   : > { %1748 = vrot.lane.b32.xlu0 %v1662_v23, %s3042_s21  ;;  %v3655_v49 = vpop.eup %2945 }
 0x1ee   : > { %v1670_v6 = vmul.f32 %v3655_v49, %v1605_v21  ;;  %v1591_v55 = vpop.permute.xlu1 %1590  ;;  %v1482_v21 = vmul.f32 %v3520_v7, %v3354_v36  ;;  %v1486_v36 = vmul.f32 %v3537_v10, %v3387_v25  ;;  %v1487_v25 = vmul.f32 %v3548_v2, %v3408_v61 }
 0x1ef   : > { %v3657_v44 = vpop.eup %2947 }
 0x1f0   : > { %v1669_v0 = vmul.f32 %v3657_v44, %v1603_v58  ;;  %v1480_v58 = vmul.f32 %v3526_v31, %v3342_v14 }
 0x1f1   : > { %1764 = vrot.lane.b32.xlu0 %v1670_v6, %s3042_s21  ;;  %v3663_v18 = vpop.eup %2949 }
 0x1f2   : > { %1762 = vrot.lane.b32.xlu1 %v1669_v0, %s3042_s21  ;;  %4098 = vst [vmem:[#allocation11_spill] sm:$0xff] %v3663_v18  ;;  %v1663_v28 = vmul.f32 %v3663_v18, %v1591_v55  ;;  %v3667_v60 = vpop.eup %2951  ;;  %v1483_v0 = vmul.f32 %v3529_v34, %v3368_v62 }
 0x1f3   : > { %v1671_v8 = vmul.f32 %v3667_v60, %v1607_v50 }
 0x1f6   : > { %1750 = vrot.lane.b32.xlu1 %v1663_v28, %s3042_s21 }
 0x1fa   : > { %1766 = vrot.lane.b32.xlu1 %v1671_v8, %s3042_s21  ;;  %v1481_v8 = vmul.f32 %v3534_v16, %v3358_v39 }
 0x217   : > { %v1709_v23 = vpop.permute.xlu0 %1708 }
 0x218   : > { %v3673_v6 = vadd.f32 %v1709_v23, %v1482_v21 }
 0x219   : > { %v1711_v28 = vpop.permute.xlu1 %1710 }
 0x21a   : > { %2953 = vtanh.f32 %v3673_v6  ;;  %v3682_v50 = vadd.f32 %v1711_v28, %v1483_v0 }
 0x21b   : > { %v1705_v55 = vpop.permute.xlu0 %1704 }
 0x21c   : > { %v3680_v18 = vadd.f32 %v1705_v55, %v1480_v58  ;;  %4099 = vst [vmem:[#allocation12_spill] sm:$0xff] %v3682_v50  ;;  %v1484_v58 = vmul.f32 %v3545_v3, %v3370_v63 }
 0x21e   : > { %2955 = vtanh.f32 %v3680_v18 }
 0x21f   : > { %2957 = vtanh.f32 %v3682_v50  ;;  %v1717_v14 = vpop.permute.xlu0 %1716 }
 0x220   : > { %v1707_v21 = vpop.permute.xlu1 %1706  ;;  %v3690_v23 = vadd.f32 %v1717_v14, %v1486_v36  ;;  %v1485_v36 = vmul.f32 %v3556_v45, %v3385_v22 }
 0x221   : > { %v3692_v62 = vadd.f32 %v1707_v21, %v1481_v8  ;;  %v1490_v21 = vmul.f32 %v3560_v5, %v3441_v47 }
 0x222   : > { %2959 = vtanh.f32 %v3690_v23 }
 0x223   : > { %2961 = vtanh.f32 %v3692_v62  ;;  %v1713_v0 = vpop.permute.xlu0 %1712 }
 0x224   : > { %v2954_v39 = vpop.eup %2953  ;;  %v1719_v55 = vpop.permute.xlu1 %1718  ;;  %v3700_v28 = vadd.f32 %v1713_v0, %v1484_v58 }
 0x225   : > { %v3702_v50 = vadd.f32 %v1719_v55, %v1487_v25  ;;  %1900 = vrot.lane.b32.xlu0 %v2954_v39, %s3042_s21  ;;  %v1488_v55 = vmul.f32 %v3567_v46, %v3410_v1  ;;  %v1489_v1 = vmul.f32 %v3575_v13, %v3439_v24  ;;  %v1494_v24 = vmul.f32 %v3586_v56, %v3457_v57 }
 0x226   : > { %2963 = vtanh.f32 %v3700_v28  ;;  %v1495_v57 = vmul.f32 %v3595_v33, %v3463_v52 }
 0x227   : > { %2965 = vtanh.f32 %v3702_v50  ;;  %v1725_v25 = vpop.permute.xlu0 %1724 }
 0x228   : > { %v2956_v63 = vpop.eup %2955  ;;  %v1715_v8 = vpop.permute.xlu1 %1714  ;;  %v3716_v39 = vadd.f32 %v1725_v25, %v1490_v21 }
 0x229   : > { %v2958_v61 = vpop.eup %2957  ;;  %1896 = vrot.lane.b32.xlu0 %v2956_v63, %s3042_s21  ;;  %v3710_v14 = vadd.f32 %v1715_v8, %v1485_v36 }
 0x22a   : > { %1902 = vrot.lane.b32.xlu1 %v2958_v61, %s3042_s21  ;;  %v1491_v61 = vmul.f32 %v3571_v54, %v3446_v51  ;;  %v1492_v51 = vmul.f32 %v3582_v17, %v3450_v12 }
 0x22b   : > { %2967 = vtanh.f32 %v3710_v14  ;;  %v1721_v36 = vpop.permute.xlu0 %1720 }
 0x22c   : > { %v2960_v58 = vpop.eup %2959  ;;  %2969 = vtanh.f32 %v3716_v39  ;;  %v3724_v47 = vadd.f32 %v1721_v36, %v1488_v55  ;;  %v1727_v8 = vpop.permute.xlu1 %1726 }
 0x22d   : > { %v2962_v0 = vpop.eup %2961  ;;  %1908 = vrot.lane.b32.xlu0 %v2960_v58, %s3042_s21  ;;  %v3730_v21 = vadd.f32 %v1727_v8, %v1491_v61  ;;  %v1493_v61 = vmul.f32 %v3589_v29, %v3454_v53 }
 0x22e   : > { %1898 = vrot.lane.b32.xlu1 %v2962_v0, %s3042_s21  ;;  %2971 = vtanh.f32 %v3724_v47 }
 0x22f   : > { %2973 = vtanh.f32 %v3730_v21 }
 0x230   : > { %v2964_v22 = vpop.eup %2963  ;;  %v1723_v25 = vpop.permute.xlu1 %1722 }
 0x231   : > { %v2966_v63 = vpop.eup %2965  ;;  %1904 = vrot.lane.b32.xlu0 %v2964_v22, %s3042_s21  ;;  %v3736_v22 = vadd.f32 %v1723_v25, %v1489_v1 }
 0x232   : > { %1910 = vrot.lane.b32.xlu1 %v2966_v63, %s3042_s21  ;;  %v1729_v55 = vpop.permute.xlu0 %1728 }
 0x233   : > { %2975 = vtanh.f32 %v3736_v22  ;;  %v3742_v63 = vadd.f32 %v1729_v55, %v1492_v51 }
 0x235   : > { %v2968_v58 = vpop.eup %2967  ;;  %2977 = vtanh.f32 %v3742_v63 }
 0x236   : > { %1906 = vrot.lane.b32.xlu1 %v2968_v58, %s3042_s21  ;;  %v2970_v0 = vpop.eup %2969  ;;  %v1733_v8 = vpop.permute.xlu0 %1732 }
 0x237   : > { %1916 = vrot.lane.b32.xlu0 %v2970_v0, %s3042_s21  ;;  %v3750_v12 = vadd.f32 %v1733_v8, %v1494_v24  ;;  %v1496_v0 = vmul.f32 %v3598_v37, %v3465_v9  ;;  %v1498_v8 = vmul.f32 %v3609_v27, %v3473_v20 }
 0x238   : > { %v2972_v36 = vpop.eup %2971 }
 0x239   : > { %v2974_v58 = vpop.eup %2973  ;;  %2979 = vtanh.f32 %v3750_v12 }
 0x23a   : > { %1918 = vrot.lane.b32.xlu1 %v2974_v58, %s3042_s21 }
 0x23b   : > { %1912 = vrot.lane.b32.xlu0 %v2972_v36, %s3042_s21 }
 0x23d   : > { %v2976_v53 = vpop.eup %2975 }
 0x23e   : > { %v1731_v1 = vpop.permute.xlu1 %1730  ;;  %1914 = vrot.lane.b32.xlu1 %v2976_v53, %s3042_s21 }
 0x23f   : > { %v3752_v25 = vadd.f32 %v1731_v1, %v1493_v61  ;;  %v1497_v61 = vmul.f32 %v3605_v11, %v3469_v15  ;;  %v2978_v52 = vpop.eup %2977  ;;  %v1499_v15 = vmul.f32 %v3613_v43, %v3478_v32 }
 0x240   : > { %v1737_v55 = vpop.permute.xlu0 %1736  ;;  %1920 = vrot.lane.b32.xlu0 %v2978_v52, %s3042_s21 }
 0x241   : > { %2981 = vtanh.f32 %v3752_v25  ;;  %v3763_v24 = vadd.f32 %v1737_v55, %v1496_v0  ;;  %v1506_v55 = vmul.f32 %v3618_v48, %v3506_v41 }
 0x242   : > { %v1735_v51 = vpop.permute.xlu1 %1734 }
 0x243   : > { %v3761_v36 = vadd.f32 %v1735_v51, %v1495_v57  ;;  %v2980_v0 = vpop.eup %2979 }
 0x244   : > { %1924 = vrot.lane.b32.xlu0 %v2980_v0, %s3042_s21 }
 0x245   : > { %2983 = vtanh.f32 %v3761_v36 }
 0x246   : > { %2985 = vtanh.f32 %v3763_v24  ;;  %v1739_v9 = vpop.permute.xlu1 %1738  ;;  %v1741_v1 = vpop.permute.xlu0 %1740 }
 0x247   : > { %v3772_v58 = vadd.f32 %v1739_v9, %v1497_v61  ;;  %v3776_v57 = vadd.f32 %v1741_v1, %v1498_v8  ;;  %v1504_v1 = vmul.f32 %v3625_v42, %v3499_v40 }
 0x249   : > { %4100 = vst [vmem:[#allocation13_spill] sm:$0xff] %v3772_v58  ;;  %2987 = vtanh.f32 %v3772_v58  ;;  %4101 = vst [vmem:[#allocation14_spill] sm:$0xff] %v3776_v57  ;;  %v4116_v58 = vld [vmem:[#allocation7_spill] sm:$0xff] }
 0x24a   : > { %2989 = vtanh.f32 %v3776_v57  ;;  %v1743_v51 = vpop.permute.xlu1 %1742  ;;  %v1757_v61 = vpop.permute.xlu0 %1756 }
 0x24b   : > { %v2982_v53 = vpop.eup %2981  ;;  %v3783_v20 = vadd.f32 %v1743_v51, %v1499_v15  ;;  %v3788_v9 = vadd.f32 %v1757_v61, %v1506_v55  ;;  %v1507_v15 = vmul.f32 %v3629_v4, %v3509_v26  ;;  %v1500_v55 = vmul.f32 %v3634_v59, %v3481_v35 }
 0x24c   : > { %1922 = vrot.lane.b32.xlu1 %v2982_v53, %s3042_s21 }
 0x24d   : > { %4102 = vst [vmem:[#allocation15_spill] sm:$0xff] %v3783_v20  ;;  %2991 = vtanh.f32 %v3783_v20  ;;  %4103 = vst [vmem:[#allocation16_spill] sm:$0xff] %v3788_v9  ;;  %v4115_v20 = vld [vmem:[#allocation9_spill] sm:$0xff] }
 0x24e   : > { %2993 = vtanh.f32 %v3788_v9  ;;  %v1753_v41 = vpop.permute.xlu0 %1752 }
 0x24f   : > { %v2984_v52 = vpop.eup %2983  ;;  %v3798_v53 = vadd.f32 %v1753_v41, %v1504_v1  ;;  %v1759_v51 = vpop.permute.xlu1 %1758  ;;  %v4108_v1 = vld [vmem:[#allocation10_spill] sm:$0xff] }
 0x250   : > { %v2986_v32 = vpop.eup %2985  ;;  %1926 = vrot.lane.b32.xlu1 %v2984_v52, %s3042_s21  ;;  %v3803_v61 = vadd.f32 %v1759_v51, %v1507_v15  ;;  %v4110_v15 = vld [vmem:[#allocation2_spill] sm:$0xff] }
 0x251   : > { %1928 = vrot.lane.b32.xlu0 %v2986_v32, %s3042_s21  ;;  %4104 = vst [vmem:[#allocation17_spill] sm:$0xff] %v3798_v53  ;;  %2995 = vtanh.f32 %v3798_v53  ;;  %v1501_v51 = vmul.f32 %v3643_v30, %v4110_v15  ;;  %v4112_v15 = vld [vmem:[#allocation8_spill] sm:$0xff] }
 0x252   : > { %4105 = vst [vmem:[#allocation18_spill] sm:$0xff] %v3803_v61  ;;  %v1745_v52 = vpop.permute.xlu0 %1744  ;;  %2997 = vtanh.f32 %v3803_v61 }
 0x253   : > { %v2988_v8 = vpop.eup %2987  ;;  %v3807_v32 = vadd.f32 %v1745_v52, %v1500_v55 }
 0x254   : > { %1930 = vrot.lane.b32.xlu1 %v2988_v8, %s3042_s21  ;;  %v2990_v0 = vpop.eup %2989  ;;  %v4107_v8 = vld [vmem:[#allocation5_spill] sm:$0xff] }
 0x255   : > { %1932 = vrot.lane.b32.xlu0 %v2990_v0, %s3042_s21  ;;  %4106 = vst [vmem:[#allocation19_spill] sm:$0xff] %v3807_v32  ;;  %2999 = vtanh.f32 %v3807_v32  ;;  %v1505_v41 = vmul.f32 %v4108_v1, %v4107_v8  ;;  %v4113_v32 = vld [vmem:[#allocation6_spill] sm:$0xff] }
 0x256   : > { %v1755_v35 = vpop.permute.xlu1 %1754 }
 0x257   : > { %v2992_v40 = vpop.eup %2991  ;;  %v3814_v0 = vadd.f32 %v1755_v35, %v1505_v41 }
 0x258   : > { %1934 = vrot.lane.b32.xlu1 %v2992_v40, %s3042_s21  ;;  %v2994_v26 = vpop.eup %2993 }
 0x259   : > { %1948 = vrot.lane.b32.xlu0 %v2994_v26, %s3042_s21  ;;  %4109 = vst [vmem:[#allocation5_spill] sm:$0xff] %v3814_v0  ;;  %3001 = vtanh.f32 %v3814_v0  ;;  %v1510_v0 = vmul.f32 %v3655_v49, %v4112_v15 }
 0x25a   : > { %v1747_v52 = vpop.permute.xlu1 %1746 }
 0x25b   : > { %v2996_v55 = vpop.eup %2995  ;;  %v3819_v61 = vadd.f32 %v1747_v52, %v1501_v51  ;;  %v1761_v8 = vpop.permute.xlu0 %1760 }
 0x25c   : > { %v2998_v40 = vpop.eup %2997 }
 0x25d   : > { %4111 = vst [vmem:[#allocation10_spill] sm:$0xff] %v3819_v61  ;;  %1944 = vrot.lane.b32.xlu0 %v2996_v55, %s3042_s21  ;;  %3003 = vtanh.f32 %v3819_v61  ;;  %1950 = vrot.lane.b32.xlu1 %v2998_v40, %s3042_s21  ;;  %v1508_v55 = vmul.f32 %v3647_v38, %v4113_v32  ;;  %v1511_v32 = vmul.f32 %v3667_v60, %v4115_v20 }
 0x25f   : > { %v3000_v26 = vpop.eup %2999  ;;  %v1749_v35 = vpop.permute.xlu0 %1748  ;;  %v3833_v61 = vadd.f32 %v1761_v8, %v1508_v55  ;;  %v4117_v55 = vld [vmem:[#allocation4_spill] sm:$0xff] }
 0x261   : > { %1936 = vrot.lane.b32.xlu0 %v3000_v26, %s3042_s21  ;;  %v4114_v26 = vld [vmem:[#allocation3_spill] sm:$0xff] }
 0x263   : > { %v3002_v41 = vpop.eup %3001  ;;  %v1765_v52 = vpop.permute.xlu0 %1764 }
 0x264   : > { %1946 = vrot.lane.b32.xlu1 %v3002_v41, %s3042_s21  ;;  %v1763_v53 = vpop.permute.xlu1 %1762  ;;  %v3831_v40 = vadd.f32 %v1765_v52, %v1510_v0  ;;  %v1502_v41 = vmul.f32 %v3651_v19, %v4114_v26  ;;  %v1509_v0 = vmul.f32 %v3657_v44, %v4116_v58  ;;  %v4118_v26 = vld [vmem:[#allocation11_spill] sm:$0xff] }
 0x266   : > { %3005 = vtanh.f32 %v3831_v40  ;;  %v3839_v15 = vadd.f32 %v1749_v35, %v1502_v41  ;;  %v3848_v8 = vadd.f32 %v1763_v53, %v1509_v0  ;;  %v1503_v35 = vmul.f32 %v4118_v26, %v4117_v55 }
 0x267   : > { %v3004_v51 = vpop.eup %3003  ;;  %3007 = vtanh.f32 %v3833_v61 }
 0x268   : > { %1938 = vrot.lane.b32.xlu1 %v3004_v51, %s3042_s21  ;;  %v1751_v9 = vpop.permute.xlu1 %1750  ;;  %3009 = vtanh.f32 %v3839_v15 }
 0x269   : > { %v3855_v20 = vadd.f32 %v1751_v9, %v1503_v35 }
 0x26c   : > { %v1767_v57 = vpop.permute.xlu1 %1766 }
 0x26d   : > { %v3845_v51 = vadd.f32 %v1767_v57, %v1511_v32 }
 0x26f   : > { %3011 = vtanh.f32 %v3845_v51 }
 0x270   : > { %v3006_v52 = vpop.eup %3005  ;;  %3013 = vtanh.f32 %v3848_v8 }
 0x271   : > { %1956 = vrot.lane.b32.xlu0 %v3006_v52, %s3042_s21  ;;  %v3008_v41 = vpop.eup %3007  ;;  %3015 = vtanh.f32 %v3855_v20 }
 0x272   : > { %v3010_v58 = vpop.eup %3009 }
 0x275   : > { %1952 = vrot.lane.b32.xlu0 %v3008_v41, %s3042_s21 }
 0x279   : > { %v3012_v57 = vpop.eup %3011  ;;  %1940 = vrot.lane.b32.xlu0 %v3010_v58, %s3042_s21 }
 0x27a   : > { %1958 = vrot.lane.b32.xlu1 %v3012_v57, %s3042_s21  ;;  %v3014_v53 = vpop.eup %3013 }
 0x27b   : > { %v3016_v32 = vpop.eup %3015 }
 0x27e   : > { %1954 = vrot.lane.b32.xlu1 %v3014_v53, %s3042_s21 }
 0x282   : > { %1942 = vrot.lane.b32.xlu1 %v3016_v32, %s3042_s21 }
 0x297   : > { %v1901_v0 = vpop.permute.xlu0 %1900 }
 0x298   : > { %v1994_v9 = vmul.f32 %v3520_v7, %v1901_v0 }
 0x29a   : > { %2060 = vrot.lane.b32.xlu0 %v1994_v9, %s3043_s10 }
 0x29b   : > { %v1897_v52 = vpop.permute.xlu0 %1896 }
 0x29c   : > { %v1903_v55 = vpop.permute.xlu1 %1902  ;;  %v1992_v35 = vmul.f32 %v3526_v31, %v1897_v52 }
 0x29d   : > { %v1995_v41 = vmul.f32 %v3529_v34, %v1903_v55 }
 0x29e   : > { %2056 = vrot.lane.b32.xlu0 %v1992_v35, %s3043_s10 }
 0x29f   : > { %2062 = vrot.lane.b32.xlu1 %v1995_v41, %s3043_s10  ;;  %v1909_v58 = vpop.permute.xlu0 %1908 }
 0x2a0   : > { %v1899_v57 = vpop.permute.xlu1 %1898  ;;  %v1998_v53 = vmul.f32 %v3537_v10, %v1909_v58 }
 0x2a1   : > { %v1993_v32 = vmul.f32 %v3534_v16, %v1899_v57 }
 0x2a2   : > { %2068 = vrot.lane.b32.xlu0 %v1998_v53, %s3043_s10 }
 0x2a3   : > { %2058 = vrot.lane.b32.xlu1 %v1993_v32, %s3043_s10  ;;  %v1905_v7 = vpop.permute.xlu0 %1904 }
 0x2a4   : > { %v1911_v0 = vpop.permute.xlu1 %1910  ;;  %v1996_v31 = vmul.f32 %v3545_v3, %v1905_v7 }
 0x2a5   : > { %v1999_v34 = vmul.f32 %v3548_v2, %v1911_v0 }
 0x2a6   : > { %2064 = vrot.lane.b32.xlu0 %v1996_v31, %s3043_s10 }
 0x2a7   : > { %2070 = vrot.lane.b32.xlu1 %v1999_v34, %s3043_s10 }
 0x2a8   : > { %v1907_v9 = vpop.permute.xlu1 %1906 }
 0x2a9   : > { %v1997_v52 = vmul.f32 %v3556_v45, %v1907_v9  ;;  %v1917_v10 = vpop.permute.xlu0 %1916 }
 0x2aa   : > { %v2002_v16 = vmul.f32 %v3560_v5, %v1917_v10 }
 0x2ab   : > { %2066 = vrot.lane.b32.xlu1 %v1997_v52, %s3043_s10 }
 0x2ac   : > { %2076 = vrot.lane.b32.xlu0 %v2002_v16, %s3043_s10  ;;  %v1919_v3 = vpop.permute.xlu1 %1918 }
 0x2ad   : > { %v1913_v55 = vpop.permute.xlu0 %1912  ;;  %v2003_v2 = vmul.f32 %v3571_v54, %v1919_v3 }
 0x2ae   : > { %v2000_v35 = vmul.f32 %v3567_v46, %v1913_v55 }
 0x2af   : > { %2078 = vrot.lane.b32.xlu1 %v2003_v2, %s3043_s10 }
 0x2b0   : > { %2072 = vrot.lane.b32.xlu0 %v2000_v35, %s3043_s10  ;;  %v1915_v41 = vpop.permute.xlu1 %1914 }
 0x2b1   : > { %v2001_v45 = vmul.f32 %v3575_v13, %v1915_v41 }
 0x2b2   : > { %v1921_v58 = vpop.permute.xlu0 %1920 }
 0x2b3   : > { %2074 = vrot.lane.b32.xlu1 %v2001_v45, %s3043_s10  ;;  %v2004_v5 = vmul.f32 %v3582_v17, %v1921_v58 }
 0x2b5   : > { %2080 = vrot.lane.b32.xlu0 %v2004_v5, %s3043_s10 }
 0x2b6   : > { %v1925_v57 = vpop.permute.xlu0 %1924 }
 0x2b7   : > { %v2006_v46 = vmul.f32 %v3586_v56, %v1925_v57 }
 0x2b9   : > { %2084 = vrot.lane.b32.xlu0 %v2006_v46, %s3043_s10 }
 0x2be   : > { %v1923_v53 = vpop.permute.xlu1 %1922 }
 0x2bf   : > { %v2005_v32 = vmul.f32 %v3589_v29, %v1923_v53  ;;  %v4119_v53 = vld [vmem:[#allocation12_spill] sm:$0xff] }
 0x2c1   : > { %2082 = vrot.lane.b32.xlu1 %v2005_v32, %s3043_s10 }
 0x2c2   : > { %v1927_v54 = vpop.permute.xlu1 %1926 }
 0x2c3   : > { %v2007_v13 = vmul.f32 %v3595_v33, %v1927_v54  ;;  %v1929_v7 = vpop.permute.xlu0 %1928 }
 0x2c4   : > { %v2008_v0 = vmul.f32 %v3598_v37, %v1929_v7 }
 0x2c5   : > { %2086 = vrot.lane.b32.xlu1 %v2007_v13, %s3043_s10 }
 0x2c6   : > { %v1931_v17 = vpop.permute.xlu1 %1930  ;;  %2088 = vrot.lane.b32.xlu0 %v2008_v0, %s3043_s10 }
 0x2c7   : > { %v2009_v31 = vmul.f32 %v3605_v11, %v1931_v17  ;;  %v1933_v56 = vpop.permute.xlu0 %1932 }
 0x2c8   : > { %v2010_v29 = vmul.f32 %v3609_v27, %v1933_v56 }
 0x2c9   : > { %2090 = vrot.lane.b32.xlu1 %v2009_v31, %s3043_s10 }
 0x2ca   : > { %v1935_v34 = vpop.permute.xlu1 %1934  ;;  %2092 = vrot.lane.b32.xlu0 %v2010_v29, %s3043_s10 }
 0x2cb   : > { %v2011_v33 = vmul.f32 %v3613_v43, %v1935_v34  ;;  %v1949_v37 = vpop.permute.xlu0 %1948 }
 0x2cc   : > { %v2018_v9 = vmul.f32 %v3618_v48, %v1949_v37 }
 0x2cd   : > { %2094 = vrot.lane.b32.xlu1 %v2011_v33, %s3043_s10 }
 0x2ce   : > { %2108 = vrot.lane.b32.xlu0 %v2018_v9, %s3043_s10 }
 0x2cf   : > { %v1945_v52 = vpop.permute.xlu0 %1944  ;;  %v1951_v10 = vpop.permute.xlu1 %1950 }
 0x2d0   : > { %v2016_v11 = vmul.f32 %v3625_v42, %v1945_v52  ;;  %v2019_v16 = vmul.f32 %v3629_v4, %v1951_v10 }
 0x2d2   : > { %2104 = vrot.lane.b32.xlu0 %v2016_v11, %s3043_s10  ;;  %2110 = vrot.lane.b32.xlu1 %v2019_v16, %s3043_s10 }
 0x2d3   : > { %v1937_v27 = vpop.permute.xlu0 %1936 }
 0x2d4   : > { %v2012_v43 = vmul.f32 %v3634_v59, %v1937_v27 }
 0x2d6   : > { %2096 = vrot.lane.b32.xlu0 %v2012_v43, %s3043_s10  ;;  %v1947_v55 = vpop.permute.xlu1 %1946  ;;  %v4121_v43 = vld [vmem:[#allocation14_spill] sm:$0xff] }
 0x2d7   : > { %v2017_v48 = vmul.f32 %v4108_v1, %v1947_v55 }
 0x2d9   : > { %2106 = vrot.lane.b32.xlu1 %v2017_v48, %s3043_s10  ;;  %v4122_v48 = vld [vmem:[#allocation15_spill] sm:$0xff] }
 0x2da   : > { %v1939_v35 = vpop.permute.xlu1 %1938 }
 0x2db   : > { %v2013_v42 = vmul.f32 %v3643_v30, %v1939_v35 }
 0x2dd   : > { %2098 = vrot.lane.b32.xlu1 %v2013_v42, %s3043_s10  ;;  %v4123_v42 = vld [vmem:[#allocation16_spill] sm:$0xff] }
 0x2e3   : > { %v1957_v4 = vpop.permute.xlu0 %1956 }
 0x2e4   : > { %v2022_v1 = vmul.f32 %v3655_v49, %v1957_v4 }
 0x2e7   : > { %v1953_v3 = vpop.permute.xlu0 %1952 }
 0x2e8   : > { %v2020_v2 = vmul.f32 %v3647_v38, %v1953_v3 }
 0x2ea   : > { %2112 = vrot.lane.b32.xlu0 %v2020_v2, %s3043_s10  ;;  %v4124_v2 = vld [vmem:[#allocation17_spill] sm:$0xff] }
 0x2eb   : > { %v1941_v59 = vpop.permute.xlu0 %1940 }
 0x2ec   : > { %v1959_v41 = vpop.permute.xlu1 %1958  ;;  %v2014_v45 = vmul.f32 %v3651_v19, %v1941_v59 }
 0x2ed   : > { %v2023_v57 = vmul.f32 %v3667_v60, %v1959_v41 }
 0x2ee   : > { %2100 = vrot.lane.b32.xlu0 %v2014_v45, %s3043_s10  ;;  %v4125_v45 = vld [vmem:[#allocation18_spill] sm:$0xff] }
 0x2f0   : > { %v1955_v58 = vpop.permute.xlu1 %1954 }
 0x2f1   : > { %v2021_v30 = vmul.f32 %v3657_v44, %v1955_v58 }
 0x2f2   : > { %2116 = vrot.lane.b32.xlu0 %v2022_v1, %s3043_s10 }
 0x2f3   : > { %2114 = vrot.lane.b32.xlu1 %v2021_v30, %s3043_s10  ;;  %v4126_v30 = vld [vmem:[#allocation19_spill] sm:$0xff] }
 0x2f4   : > { %v1943_v5 = vpop.permute.xlu1 %1942 }
 0x2f5   : > { %v2015_v38 = vmul.f32 %v4118_v26, %v1943_v5 }
 0x2f7   : > { %2102 = vrot.lane.b32.xlu1 %v2015_v38, %s3043_s10 }
 0x2fb   : > { %2118 = vrot.lane.b32.xlu1 %v2023_v57, %s3043_s10  ;;  %v4127_v57 = vld [vmem:[#allocation5_spill] sm:$0xff] }
 0x30c   : > { %v2061_v19 = vpop.permute.xlu0 %2060 }
 0x30d   : > { %v2155_v49 = vsel %vm2152_vm3, %v2061_v19, %v3673_v6 }
 0x30e   : > { %2188 = vst.msk [vmem:[%s3932_s24 + $0x10] sm:$0xff] %vm2185_vm4, %v2155_v49 }
 0x310   : > { %v2057_v44 = vpop.permute.xlu0 %2056 }
 0x311   : > { %v2063_v60 = vpop.permute.xlu1 %2062  ;;  %v2153_v26 = vsel %vm2152_vm3, %v2057_v44, %v3680_v18  ;;  %v4128_v44 = vld [vmem:[#allocation10_spill] sm:$0xff] }
 0x312   : > { %v2156_v46 = vsel %vm2152_vm3, %v2063_v60, %v4119_v53  ;;  %2186 = vst.msk [vmem:[%s3932_s24] sm:$0xff] %vm2185_vm4, %v2153_v26 }
 0x313   : > { %2189 = vst.msk [vmem:[%s3932_s24 + $0x18] sm:$0xff] %vm2185_vm4, %v2156_v46 }
 0x314   : > { %v2069_v32 = vpop.permute.xlu0 %2068 }
 0x315   : > { %v2059_v54 = vpop.permute.xlu1 %2058  ;;  %v2159_v6 = vsel %vm2152_vm3, %v2069_v32, %v3690_v23 }
 0x316   : > { %v2154_v13 = vsel %vm2152_vm3, %v2059_v54, %v3692_v62  ;;  %2192 = vst.msk [vmem:[%s3932_s24 + $0x30] sm:$0xff] %vm2185_vm4, %v2159_v6 }
 0x317   : > { %2187 = vst.msk [vmem:[%s3932_s24 + $0x8] sm:$0xff] %vm2185_vm4, %v2154_v13 }
 0x318   : > { %v2065_v18 = vpop.permute.xlu0 %2064 }
 0x319   : > { %v2071_v7 = vpop.permute.xlu1 %2070  ;;  %v2157_v0 = vsel %vm2152_vm3, %v2065_v18, %v3700_v28 }
 0x31a   : > { %v2160_v17 = vsel %vm2152_vm3, %v2071_v7, %v3702_v50  ;;  %2190 = vst.msk [vmem:[%s3932_s24 + $0x20] sm:$0xff] %vm2185_vm4, %v2157_v0 }
 0x31b   : > { %2193 = vst.msk [vmem:[%s3932_s24 + $0x38] sm:$0xff] %vm2185_vm4, %v2160_v17 }
 0x31d   : > { %v2067_v23 = vpop.permute.xlu1 %2066 }
 0x31e   : > { %v2158_v62 = vsel %vm2152_vm3, %v2067_v23, %v3710_v14  ;;  %v2077_v31 = vpop.permute.xlu0 %2076 }
 0x31f   : > { %2191 = vst.msk [vmem:[%s3932_s24 + $0x28] sm:$0xff] %vm2185_vm4, %v2158_v62  ;;  %v2163_v56 = vsel %vm2152_vm3, %v2077_v31, %v3716_v39 }
 0x320   : > { %2196 = vst.msk [vmem:[%s3932_s24 + $0x50] sm:$0xff] %vm2185_vm4, %v2163_v56 }
 0x321   : > { %v2079_v29 = vpop.permute.xlu1 %2078 }
 0x322   : > { %v2073_v28 = vpop.permute.xlu0 %2072  ;;  %v2164_v14 = vsel %vm2152_vm3, %v2079_v29, %v3730_v21 }
 0x323   : > { %v2161_v50 = vsel %vm2152_vm3, %v2073_v28, %v3724_v47  ;;  %2197 = vst.msk [vmem:[%s3932_s24 + $0x58] sm:$0xff] %vm2185_vm4, %v2164_v14 }
 0x324   : > { %2194 = vst.msk [vmem:[%s3932_s24 + $0x40] sm:$0xff] %vm2185_vm4, %v2161_v50 }
 0x325   : > { %v2075_v34 = vpop.permute.xlu1 %2074 }
 0x326   : > { %v2162_v39 = vsel %vm2152_vm3, %v2075_v34, %v3736_v22 }
 0x327   : > { %2195 = vst.msk [vmem:[%s3932_s24 + $0x48] sm:$0xff] %vm2185_vm4, %v2162_v39  ;;  %v2081_v33 = vpop.permute.xlu0 %2080 }
 0x328   : > { %v2165_v47 = vsel %vm2152_vm3, %v2081_v33, %v3742_v63 }
 0x329   : > { %2198 = vst.msk [vmem:[%s3932_s24 + $0x60] sm:$0xff] %vm2185_vm4, %v2165_v47 }
 0x32b   : > { %v2085_v37 = vpop.permute.xlu0 %2084 }
 0x32c   : > { %v2167_v21 = vsel %vm2152_vm3, %v2085_v37, %v3750_v12 }
 0x32d   : > { %2200 = vst.msk [vmem:[%s3932_s24 + $0x70] sm:$0xff] %vm2185_vm4, %v2167_v21 }
 0x333   : > { %v2083_v9 = vpop.permute.xlu1 %2082 }
 0x334   : > { %v2166_v52 = vsel %vm2152_vm3, %v2083_v9, %v3752_v25  ;;  %v4120_v25 = vld [vmem:[#allocation13_spill] sm:$0xff] }
 0x335   : > { %2199 = vst.msk [vmem:[%s3932_s24 + $0x68] sm:$0xff] %vm2185_vm4, %v2166_v52 }
 0x337   : > { %v2087_v22 = vpop.permute.xlu1 %2086 }
 0x338   : > { %v2168_v63 = vsel %vm2152_vm3, %v2087_v22, %v3761_v36  ;;  %v2089_v11 = vpop.permute.xlu0 %2088 }
 0x339   : > { %2201 = vst.msk [vmem:[%s3932_s24 + $0x78] sm:$0xff] %vm2185_vm4, %v2168_v63  ;;  %v2169_v10 = vsel %vm2152_vm3, %v2089_v11, %v3763_v24 }
 0x33a   : > { %2202 = vst.msk [vmem:[%s3932_s24 + $0x80] sm:$0xff] %vm2185_vm4, %v2169_v10 }
 0x33b   : > { %v2091_v12 = vpop.permute.xlu1 %2090 }
 0x33c   : > { %v2170_v16 = vsel %vm2152_vm3, %v2091_v12, %v4120_v25  ;;  %v2093_v27 = vpop.permute.xlu0 %2092 }
 0x33d   : > { %2203 = vst.msk [vmem:[%s3932_s24 + $0x88] sm:$0xff] %vm2185_vm4, %v2170_v16  ;;  %v2171_v36 = vsel %vm2152_vm3, %v2093_v27, %v4121_v43 }
 0x33e   : > { %2204 = vst.msk [vmem:[%s3932_s24 + $0x90] sm:$0xff] %vm2185_vm4, %v2171_v36 }
 0x33f   : > { %v2095_v55 = vpop.permute.xlu1 %2094 }
 0x340   : > { %v2172_v24 = vsel %vm2152_vm3, %v2095_v55, %v4122_v48  ;;  %v2109_v35 = vpop.permute.xlu0 %2108 }
 0x341   : > { %2205 = vst.msk [vmem:[%s3932_s24 + $0x98] sm:$0xff] %vm2185_vm4, %v2172_v24  ;;  %v2179_v4 = vsel %vm2152_vm3, %v2109_v35, %v4123_v42 }
 0x342   : > { %2212 = vst.msk [vmem:[%s3932_s24 + $0xd0] sm:$0xff] %vm2185_vm4, %v2179_v4 }
 0x344   : > { %v2105_v3 = vpop.permute.xlu0 %2104  ;;  %v2111_v41 = vpop.permute.xlu1 %2110 }
 0x345   : > { %v2177_v59 = vsel %vm2152_vm3, %v2105_v3, %v4124_v2  ;;  %v2180_v1 = vsel %vm2152_vm3, %v2111_v41, %v4125_v45 }
 0x346   : > { %2210 = vst.msk [vmem:[%s3932_s24 + $0xc0] sm:$0xff] %vm2185_vm4, %v2177_v59  ;;  %2213 = vst.msk [vmem:[%s3932_s24 + $0xd8] sm:$0xff] %vm2185_vm4, %v2180_v1 }
 0x348   : > { %v2097_v58 = vpop.permute.xlu0 %2096 }
 0x349   : > { %v2173_v5 = vsel %vm2152_vm3, %v2097_v58, %v4126_v30 }
 0x34a   : > { %2206 = vst.msk [vmem:[%s3932_s24 + $0xa0] sm:$0xff] %vm2185_vm4, %v2173_v5 }
 0x34b   : > { %v2107_v38 = vpop.permute.xlu1 %2106 }
 0x34c   : > { %v2178_v19 = vsel %vm2152_vm3, %v2107_v38, %v4127_v57 }
 0x34d   : > { %2211 = vst.msk [vmem:[%s3932_s24 + $0xc8] sm:$0xff] %vm2185_vm4, %v2178_v19 }
 0x34f   : > { %v2099_v49 = vpop.permute.xlu1 %2098 }
 0x350   : > { %v2174_v60 = vsel %vm2152_vm3, %v2099_v49, %v4128_v44 }
 0x351   : > { %2207 = vst.msk [vmem:[%s3932_s24 + $0xa8] sm:$0xff] %vm2185_vm4, %v2174_v60 }
 0x35c   : > { %v2113_v26 = vpop.permute.xlu0 %2112 }
 0x35d   : > { %v2181_v53 = vsel %vm2152_vm3, %v2113_v26, %v3833_v61 }
 0x35e   : > { %2214 = vst.msk [vmem:[%s3932_s24 + $0xe0] sm:$0xff] %vm2185_vm4, %v2181_v53 }
 0x360   : > { %v2101_v46 = vpop.permute.xlu0 %2100 }
 0x361   : > { %v2175_v32 = vsel %vm2152_vm3, %v2101_v46, %v3839_v15 }
 0x362   : > { %2208 = vst.msk [vmem:[%s3932_s24 + $0xb0] sm:$0xff] %vm2185_vm4, %v2175_v32 }
 0x364   : > { %v2117_v54 = vpop.permute.xlu0 %2116 }
 0x365   : > { %v2115_v6 = vpop.permute.xlu1 %2114  ;;  %v2183_v13 = vsel %vm2152_vm3, %v2117_v54, %v3831_v40 }
 0x366   : > { %v2182_v18 = vsel %vm2152_vm3, %v2115_v6, %v3848_v8  ;;  %2216 = vst.msk [vmem:[%s3932_s24 + $0xf0] sm:$0xff] %vm2185_vm4, %v2183_v13 }
 0x367   : > { %2215 = vst.msk [vmem:[%s3932_s24 + $0xe8] sm:$0xff] %vm2185_vm4, %v2182_v18 }
 0x369   : > { %v2103_v61 = vpop.permute.xlu1 %2102 }
 0x36a   : > { %v2176_v7 = vsel %vm2152_vm3, %v2103_v61, %v3855_v20 }
 0x36b   : > { %2209 = vst.msk [vmem:[%s3932_s24 + $0xb8] sm:$0xff] %vm2185_vm4, %v2176_v7 }
 0x36d   : > { %v2119_v15 = vpop.permute.xlu1 %2118 }
 0x36e   : > { %v2184_v0 = vsel %vm2152_vm3, %v2119_v15, %v3845_v51 }
 0x36f   : > { %2217 = vst.msk [vmem:[%s3932_s24 + $0xf8] sm:$0xff] %vm2185_vm4, %v2184_v0 }
 0x370 PF: > { %s13_s14 = sadd.s32 1, %s3039_s14   ;;  %s4129_s12 = smov %s3035_s13 }
 0x371   : > { %p10_p5 = scmp.ge.s32.totalorder %s13_s14, 4   ;;  %s4130_s13 = smov %s4132_s15 }
 0x373   :  { %12 = sbr.rel (!%p10_p5) target bundleno = 2 (0x2), region = 65 }

</bundles_post_ra>
